<compile_context>
chip_gen: v6e
topology: v6e:2x2x1
jax: 0.10.0
libtpu: 0.0.40
codegen_flags: <defaults>
</compile_context>

<pallas_src>
import functools

import jax
import jax.numpy as jnp
from jax.experimental import pallas as pl
from jax.experimental.pallas import tpu as pltpu


# ---------------------------------------------------------------------------
# Shared decode body (g_ref=None => exact greedy argmax, no noise operand).
# ---------------------------------------------------------------------------
def _decode(z_ref,      # (TB, H)    latent z (f32)
            g_ref,      # (L, TB, T) Gumbel noise ref, or None (greedy)
            Woh_ref,    # (T, 4H)    bf16: [E@Wi_r | E@Wi_z | E@Wi_n | E@W1_emb]
            Wz7_ref,    # (H, 7H)    bf16: [Wiz_r|Wiz_z|Wiz_n|W1_z | Wh_r|Wh_z|Wh_n]
            Wh4_ref,    # (H, 4H)    bf16: [Wh_r | Wh_z | Wh_n | W1_h]
            bs_ref,     # (1, 4H)    f32:  [bi_r+bh_r | bi_z+bh_z | bi_n | b1]
            bhn_ref,    # (1, H)     f32:  b_hn (stays inside r * (.))
            W2_ref,     # (H, T)     bf16: output layer 2
            b2_ref,     # (1, T)     f32
            out_ref,    # (TB, L)    int32 pred_programs
            *, num_tokens: int, hidden: int, max_len: int):
    B = z_ref.shape[0]
    T, H, L = num_tokens, hidden, max_len

    z = z_ref[...]                                          # (B, H) f32

    # Hoisted preamble: one matmul gives both
    #   zb  (B,4H): loop-invariant z contribution to [r, z, n, out1] + biases
    #   h_g (B,3H): hidden-side gate pre-activation for step 0 (h0 = z)
    z7 = jnp.dot(z.astype(jnp.bfloat16), Wz7_ref[...],
                 preferred_element_type=jnp.float32)        # (B, 7H)
    zb = z7[:, 0:4 * H] + bs_ref[...]                       # (B, 4H)
    h_g = z7[:, 4 * H:7 * H]                                # (B, 3H)
    bhn = bhn_ref[...]                                      # (1, H)
    b2 = b2_ref[...]                                        # (1, T)

    lane_t = jax.lax.broadcasted_iota(jnp.int32, (B, T), 1)

    h = z                                                   # GRU hidden init = latent
    tok = jnp.full((B, 1), T - 1, dtype=jnp.int32)          # <sos>/<pad> start token

    toks = []
    for i in range(L):                                      # static unroll (L small)
        # Embedding lookup folded into the stacked weights: one 128-lane-dense
        # MXU matmul covers emb->(r,z,n) gates AND emb->output-layer-1.
        onehot = (lane_t == tok).astype(jnp.bfloat16)       # (B, T)
        i_all = jnp.dot(onehot, Woh_ref[...],
                        preferred_element_type=jnp.float32) + zb     # (B, 4H)

        # GRU cell (PyTorch gate order r, z, n; b_hn inside r * (.)); h_g was
        # produced by the previous iteration's fused hidden-side matmul.
        r = jax.nn.sigmoid(i_all[:, 0:H] + h_g[:, 0:H])
        zg = jax.nn.sigmoid(i_all[:, H:2 * H] + h_g[:, H:2 * H])
        n = jnp.tanh(i_all[:, 2 * H:3 * H] + r * (h_g[:, 2 * H:3 * H] + bhn))
        h = (1.0 - zg) * n + zg * h

        # Fused hidden-side matmul: columns 0:3H feed NEXT step's gates,
        # columns 3H:4H are THIS step's output-layer-1 hidden contribution.
        hg4 = jnp.dot(h.astype(jnp.bfloat16), Wh4_ref[...],
                      preferred_element_type=jnp.float32)            # (B, 4H)
        h_g = hg4[:, 0:3 * H]

        # token_output_layer: Linear(concat(h, emb, z)) -> tanh -> Linear
        hid = jnp.tanh(hg4[:, 3 * H:4 * H] + i_all[:, 3 * H:4 * H])
        logits = jnp.dot(hid.astype(jnp.bfloat16), W2_ref[...],
                         preferred_element_type=jnp.float32) + b2

        if g_ref is not None:                               # Gumbel-max sampling
            logits = logits + g_ref[i]

        # argmax over tokens (first occurrence on ties).
        mx = jnp.max(logits, axis=-1, keepdims=True)
        cand = jnp.where(logits >= mx, lane_t, T)
        tok = jnp.min(cand, axis=-1, keepdims=True).astype(jnp.int32)
        toks.append(tok)

    # Single lane-dense(ish) store instead of L masked single-lane stores.
    out_ref[...] = jnp.concatenate(toks, axis=1)            # (B, L) int32


def _greedy_kernel(z_ref, Woh_ref, Wz7_ref, Wh4_ref, bs_ref, bhn_ref,
                   W2_ref, b2_ref, out_ref, **kw):
    _decode(z_ref, None, Woh_ref, Wz7_ref, Wh4_ref, bs_ref, bhn_ref,
            W2_ref, b2_ref, out_ref, **kw)


def _sample_kernel(z_ref, g_ref, Woh_ref, Wz7_ref, Wh4_ref, bs_ref, bhn_ref,
                   W2_ref, b2_ref, out_ref, **kw):
    _decode(z_ref, g_ref, Woh_ref, Wz7_ref, Wh4_ref, bs_ref, bhn_ref,
            W2_ref, b2_ref, out_ref, **kw)


# ---------------------------------------------------------------------------
# Host-side parameter construction + packing into the fused kernel layout.
# ---------------------------------------------------------------------------
def init_decoder_params(key, num_tokens: int, hidden: int):
    """Raw parameters in PyTorch-equivalent layout (stored (in, out))."""
    T, H = num_tokens, hidden
    ks = jax.random.split(key, 12)
    s = 0.2
    return {
        "E":   s * jax.random.normal(ks[0], (T, T), jnp.float32),     # nn.Embedding(T, T)
        "Wie": s * jax.random.normal(ks[1], (3, T, H), jnp.float32),  # GRU W_i, emb chunk (r,z,n)
        "Wiz": s * jax.random.normal(ks[2], (3, H, H), jnp.float32),  # GRU W_i, z chunk
        "bi":  s * jax.random.normal(ks[3], (3, 1, H), jnp.float32),
        "Wh":  s * jax.random.normal(ks[4], (3, H, H), jnp.float32),  # GRU W_h (r,z,n)
        "bh":  s * jax.random.normal(ks[5], (3, 1, H), jnp.float32),
        "W1h": s * jax.random.normal(ks[6], (H, H), jnp.float32),     # out layer1, h chunk
        "W1e": s * jax.random.normal(ks[7], (T, H), jnp.float32),     # out layer1, emb chunk
        "W1z": s * jax.random.normal(ks[8], (H, H), jnp.float32),     # out layer1, z chunk
        "b1":  s * jax.random.normal(ks[9], (1, H), jnp.float32),
        "W2":  s * jax.random.normal(ks[10], (H, T), jnp.float32),
        "b2":  s * jax.random.normal(ks[11], (1, T), jnp.float32),
    }


def pack_decoder_params(p):
    """Fold E into downstream weights, stack gates, fuse invariant biases."""
    E = p["E"]
    EWi = jnp.einsum("tv,gvh->gth", E, p["Wie"])                       # (3, T, H)
    EW1e = E @ p["W1e"]                                                # (T, H)
    Woh = jnp.concatenate([EWi[0], EWi[1], EWi[2], EW1e], axis=1)      # (T, 4H)
    # z-side preamble matrix: [Wiz_r|Wiz_z|Wiz_n|W1_z | Wh_r|Wh_z|Wh_n]  (H, 7H)
    Wz7 = jnp.concatenate([p["Wiz"][0], p["Wiz"][1], p["Wiz"][2], p["W1z"],
                           p["Wh"][0], p["Wh"][1], p["Wh"][2]], axis=1)
    # hidden-side per-step matrix: [Wh_r|Wh_z|Wh_n|W1_h]                 (H, 4H)
    Wh4 = jnp.concatenate([p["Wh"][0], p["Wh"][1], p["Wh"][2], p["W1h"]], axis=1)
    bs = jnp.concatenate([p["bi"][0] + p["bh"][0],
                          p["bi"][1] + p["bh"][1],
                          p["bi"][2],
                          p["b1"]], axis=1)                            # (1, 4H)
    return {
        "Woh": Woh.astype(jnp.bfloat16),
        "Wz7": Wz7.astype(jnp.bfloat16),
        "Wh4": Wh4.astype(jnp.bfloat16),
        "bs":  bs.astype(jnp.float32),
        "bhn": p["bh"][2].astype(jnp.float32),
        "W2":  p["W2"].astype(jnp.bfloat16),
        "b2":  p["b2"].astype(jnp.float32),
    }


# ---------------------------------------------------------------------------
# Grid sizing: split the batch only when there are >=2 TensorCores (v7x) and
# each half still satisfies the 8-sublane blocking constraint.
# ---------------------------------------------------------------------------
def _num_tensorcores() -> int:
    try:
        info = pltpu.get_tpu_info()
        for attr in ("num_cores", "num_tensorcores", "tensorcore_count",
                     "cores_per_chip"):
            n = getattr(info, attr, None)
            if isinstance(n, int) and n > 0:
                return n
    except Exception:
        pass
    try:
        kind = (getattr(jax.devices()[0], "device_kind", "") or "").lower()
        if "v7" in kind:
            return 2
    except Exception:
        pass
    return 1   # safe default: single grid step everywhere


def _batch_tile(B: int) -> int:
    # On single-TC v5e/v6e a 2-step grid just replays the whole serial decode
    # twice with half-size (sublane-starved) matmuls — keep grid=(1,) there.
    if _num_tensorcores() >= 2 and B % 16 == 0:
        return B // 2
    return B


def cross_entropy_net_forward(h_meta, packed, *, max_program_len: int,
                              deterministic: bool = False, rng_key=None):
    """CrossEntropyNet.forward(h_meta, deterministic) -> pred_programs (B, L) int32."""
    B, H = h_meta.shape
    T = packed["b2"].shape[-1]
    L = max_program_len

    TB = _batch_tile(B)
    grid = (B // TB,)

    rep = lambda b: (0, 0)                                  # weights: resident, replicated
    weight_specs = [
        pl.BlockSpec((T, 4 * H), rep),                      # Woh
        pl.BlockSpec((H, 7 * H), rep),                      # Wz7
        pl.BlockSpec((H, 4 * H), rep),                      # Wh4
        pl.BlockSpec((1, 4 * H), rep),                      # bs
        pl.BlockSpec((1, H), rep),                          # bhn
        pl.BlockSpec((H, T), rep),                          # W2
        pl.BlockSpec((1, T), rep),                          # b2
    ]
    weights = (packed["Woh"], packed["Wz7"], packed["Wh4"], packed["bs"],
               packed["bhn"], packed["W2"], packed["b2"])

    z_spec = pl.BlockSpec((TB, H), lambda b: (b, 0))
    out_spec = pl.BlockSpec((TB, L), lambda b: (b, 0))
    out_shape = jax.ShapeDtypeStruct((B, L), jnp.int32)
    cparams = pltpu.CompilerParams(dimension_semantics=("parallel",))

    z = h_meta.astype(jnp.float32)

    if deterministic:
        # Greedy path specialized at trace time: no gumbel operand / DMA / add.
        kernel = functools.partial(_greedy_kernel,
                                   num_tokens=T, hidden=H, max_len=L)
        return pl.pallas_call(
            kernel, out_shape=out_shape, grid=grid,
            in_specs=[z_spec] + weight_specs, out_specs=out_spec,
            compiler_params=cparams,
        )(z, *weights)

    if rng_key is None:
        raise ValueError("rng_key is required when deterministic=False")
    gumbel = jax.random.gumbel(rng_key, (L, B, T), jnp.float32)
    g_spec = pl.BlockSpec((L, TB, T), lambda b: (0, b, 0))
    kernel = functools.partial(_sample_kernel,
                               num_tokens=T, hidden=H, max_len=L)
    return pl.pallas_call(
        kernel, out_shape=out_shape, grid=grid,
        in_specs=[z_spec, g_spec] + weight_specs, out_specs=out_spec,
        compiler_params=cparams,
    )(z, gumbel, *weights)


if __name__ == "__main__":
    # Small, module-consistent sizes:
    #   batch B=2, latent/hidden H=32, program-token vocab T=16, max_program_len L=8
    # (For real CEM use, batch many candidates per call — per-token latency is
    #  flat in B until sublanes/MXU rows fill, so throughput scales ~free.)
    B, H, T, L = 2, 32, 16, 8

    key = jax.random.PRNGKey(0)
    k_params, k_z, k_sample = jax.random.split(key, 3)
    raw_params = init_decoder_params(k_params, num_tokens=T, hidden=H)
    packed = pack_decoder_params(raw_params)
    h_meta = jax.random.normal(k_z, (B, H), jnp.float32)    # CEM latent vector z

    # Greedy decode (deterministic=True) and sampled decode (module default).
    prog_det = cross_entropy_net_forward(h_meta, packed, max_program_len=L,
                                         deterministic=True)
    prog_smp = cross_entropy_net_forward(h_meta, packed, max_program_len=L,
                                         deterministic=False, rng_key=k_sample)

    jax.block_until_ready((prog_det, prog_smp))

    assert prog_det.shape == (B, L) and prog_det.dtype == jnp.int32
    assert prog_smp.shape == (B, L) and prog_smp.dtype == jnp.int32
    assert bool(jnp.all((prog_det >= 0) & (prog_det < T)))
    assert bool(jnp.all((prog_smp >= 0) & (prog_smp < T)))

    print("KERNEL_OK")
</pallas_src>

<mosaic_0001>
module attributes {stable_mosaic.version = 11 : i64} {
  func.func @_greedy_kernel(%arg0: i32, %arg1: memref<2x32xf32, #tpu.memory_space<vmem>>, %arg2: memref<16x128xbf16, #tpu.memory_space<vmem>>, %arg3: memref<32x224xbf16, #tpu.memory_space<vmem>>, %arg4: memref<32x128xbf16, #tpu.memory_space<vmem>>, %arg5: memref<1x128xf32, #tpu.memory_space<vmem>>, %arg6: memref<1x32xf32, #tpu.memory_space<vmem>>, %arg7: memref<32x16xbf16, #tpu.memory_space<vmem>>, %arg8: memref<1x16xf32, #tpu.memory_space<vmem>>, %arg9: memref<2x8xi32, #tpu.memory_space<vmem>>) attributes {dimension_semantics = [#tpu.dimension_semantics<parallel>], iteration_bounds = array<i64: 1>, scalar_prefetch = 0 : i64, scratch_operands = 0 : i64, tpu.core_type = #tpu.core_type<tc>, window_params = [{transform_indices = @transform_0, window_bounds = array<i64: 2, 32>}, {pipeline_mode = #tpu.pipeline_mode<synchronous>, transform_indices = @transform_1, window_bounds = array<i64: 16, 128>}, {pipeline_mode = #tpu.pipeline_mode<synchronous>, transform_indices = @transform_2, window_bounds = array<i64: 32, 224>}, {pipeline_mode = #tpu.pipeline_mode<synchronous>, transform_indices = @transform_3, window_bounds = array<i64: 32, 128>}, {pipeline_mode = #tpu.pipeline_mode<synchronous>, transform_indices = @transform_4, window_bounds = array<i64: 1, 128>}, {pipeline_mode = #tpu.pipeline_mode<synchronous>, transform_indices = @transform_5, window_bounds = array<i64: 1, 32>}, {pipeline_mode = #tpu.pipeline_mode<synchronous>, transform_indices = @transform_6, window_bounds = array<i64: 32, 16>}, {pipeline_mode = #tpu.pipeline_mode<synchronous>, transform_indices = @transform_7, window_bounds = array<i64: 1, 16>}, {transform_indices = @transform_8, window_bounds = array<i64: 2, 8>}]} {
    %c0 = arith.constant 0 : index
    %c0_0 = arith.constant 0 : index
    %0 = vector.load %arg1[%c0, %c0_0] : memref<2x32xf32, #tpu.memory_space<vmem>>, vector<2x32xf32>
    %1 = arith.truncf %0 : vector<2x32xf32> to vector<2x32xbf16>
    %c0_1 = arith.constant 0 : index
    %c0_2 = arith.constant 0 : index
    %2 = vector.load %arg3[%c0_1, %c0_2] : memref<32x224xbf16, #tpu.memory_space<vmem>>, vector<32x224xbf16>
    %cst = arith.constant dense<0.000000e+00> : vector<2x224xf32>
    %3 = tpu.matmul %1, %2, %cst {dimension_numbers = #tpu.dot_dimension_numbers<[1], [0], [0], [1], [0, 0, 1, 1], [], []>} : vector<2x32xbf16>, vector<32x224xbf16>, vector<2x224xf32> -> vector<2x224xf32>
    %4 = vector.extract_strided_slice %3 {offsets = [0, 0], sizes = [2, 128], strides = [1, 1]} : vector<2x224xf32> to vector<2x128xf32>
    %c0_3 = arith.constant 0 : index
    %c0_4 = arith.constant 0 : index
    %5 = vector.load %arg5[%c0_3, %c0_4] : memref<1x128xf32, #tpu.memory_space<vmem>>, vector<1x128xf32>
    %6 = vector.broadcast %5 : vector<1x128xf32> to vector<2x128xf32>
    %7 = arith.addf %4, %6 : vector<2x128xf32>
    %8 = vector.extract_strided_slice %3 {offsets = [0, 128], sizes = [2, 96], strides = [1, 1]} : vector<2x224xf32> to vector<2x96xf32>
    %c0_5 = arith.constant 0 : index
    %c0_6 = arith.constant 0 : index
    %9 = vector.load %arg6[%c0_5, %c0_6] : memref<1x32xf32, #tpu.memory_space<vmem>>, vector<1x32xf32>
    %c0_7 = arith.constant 0 : index
    %c0_8 = arith.constant 0 : index
    %10 = vector.load %arg8[%c0_7, %c0_8] : memref<1x16xf32, #tpu.memory_space<vmem>>, vector<1x16xf32>
    %11 = tpu.iota {dimensions = array<i32: 1>} : vector<2x16xi32>
    %c15_i32 = arith.constant 15 : i32
    %12 = vector.broadcast %c15_i32 : i32 to vector<2x1xi32>
    %13 = vector.broadcast %12 : vector<2x1xi32> to vector<2x16xi32>
    %14 = arith.cmpi eq, %11, %13 : vector<2x16xi32>
    %15 = arith.extui %14 : vector<2x16xi1> to vector<2x16xi32>
    %16 = arith.sitofp %15 : vector<2x16xi32> to vector<2x16xf32>
    %17 = arith.truncf %16 : vector<2x16xf32> to vector<2x16xbf16>
    %c0_9 = arith.constant 0 : index
    %c0_10 = arith.constant 0 : index
    %18 = vector.load %arg2[%c0_9, %c0_10] : memref<16x128xbf16, #tpu.memory_space<vmem>>, vector<16x128xbf16>
    %cst_11 = arith.constant dense<0.000000e+00> : vector<2x128xf32>
    %19 = tpu.matmul %17, %18, %cst_11 {dimension_numbers = #tpu.dot_dimension_numbers<[1], [0], [0], [1], [0, 0, 1, 1], [], []>} : vector<2x16xbf16>, vector<16x128xbf16>, vector<2x128xf32> -> vector<2x128xf32>
    %20 = arith.addf %19, %7 : vector<2x128xf32>
    %21 = vector.extract_strided_slice %20 {offsets = [0, 0], sizes = [2, 32], strides = [1, 1]} : vector<2x128xf32> to vector<2x32xf32>
    %22 = vector.extract_strided_slice %8 {offsets = [0, 0], sizes = [2, 32], strides = [1, 1]} : vector<2x96xf32> to vector<2x32xf32>
    %23 = arith.addf %21, %22 : vector<2x32xf32>
    %24 = arith.negf %23 : vector<2x32xf32>
    %25 = math.exp %24 : vector<2x32xf32>
    %cst_12 = arith.constant 1.000000e+00 : f32
    %26 = vector.broadcast %cst_12 : f32 to vector<2x32xf32>
    %27 = arith.addf %26, %25 : vector<2x32xf32>
    %28 = arith.divf %26, %27 : vector<2x32xf32>
    %29 = vector.extract_strided_slice %20 {offsets = [0, 32], sizes = [2, 32], strides = [1, 1]} : vector<2x128xf32> to vector<2x32xf32>
    %30 = vector.extract_strided_slice %8 {offsets = [0, 32], sizes = [2, 32], strides = [1, 1]} : vector<2x96xf32> to vector<2x32xf32>
    %31 = arith.addf %29, %30 : vector<2x32xf32>
    %32 = arith.negf %31 : vector<2x32xf32>
    %33 = math.exp %32 : vector<2x32xf32>
    %cst_13 = arith.constant 1.000000e+00 : f32
    %34 = vector.broadcast %cst_13 : f32 to vector<2x32xf32>
    %35 = arith.addf %34, %33 : vector<2x32xf32>
    %36 = arith.divf %34, %35 : vector<2x32xf32>
    %37 = vector.extract_strided_slice %20 {offsets = [0, 64], sizes = [2, 32], strides = [1, 1]} : vector<2x128xf32> to vector<2x32xf32>
    %38 = vector.extract_strided_slice %8 {offsets = [0, 64], sizes = [2, 32], strides = [1, 1]} : vector<2x96xf32> to vector<2x32xf32>
    %39 = vector.broadcast %9 : vector<1x32xf32> to vector<2x32xf32>
    %40 = arith.addf %38, %39 : vector<2x32xf32>
    %41 = arith.mulf %28, %40 : vector<2x32xf32>
    %42 = arith.addf %37, %41 : vector<2x32xf32>
    %43 = math.tanh %42 : vector<2x32xf32>
    %cst_14 = arith.constant 1.000000e+00 : f32
    %44 = vector.broadcast %cst_14 : f32 to vector<2x32xf32>
    %45 = arith.subf %44, %36 : vector<2x32xf32>
    %46 = arith.mulf %45, %43 : vector<2x32xf32>
    %47 = arith.mulf %36, %0 : vector<2x32xf32>
    %48 = arith.addf %46, %47 : vector<2x32xf32>
    %49 = arith.truncf %48 : vector<2x32xf32> to vector<2x32xbf16>
    %c0_15 = arith.constant 0 : index
    %c0_16 = arith.constant 0 : index
    %50 = vector.load %arg4[%c0_15, %c0_16] : memref<32x128xbf16, #tpu.memory_space<vmem>>, vector<32x128xbf16>
    %cst_17 = arith.constant dense<0.000000e+00> : vector<2x128xf32>
    %51 = tpu.matmul %49, %50, %cst_17 {dimension_numbers = #tpu.dot_dimension_numbers<[1], [0], [0], [1], [0, 0, 1, 1], [], []>} : vector<2x32xbf16>, vector<32x128xbf16>, vector<2x128xf32> -> vector<2x128xf32>
    %52 = vector.extract_strided_slice %51 {offsets = [0, 0], sizes = [2, 96], strides = [1, 1]} : vector<2x128xf32> to vector<2x96xf32>
    %53 = vector.extract_strided_slice %51 {offsets = [0, 96], sizes = [2, 32], strides = [1, 1]} : vector<2x128xf32> to vector<2x32xf32>
    %54 = vector.extract_strided_slice %20 {offsets = [0, 96], sizes = [2, 32], strides = [1, 1]} : vector<2x128xf32> to vector<2x32xf32>
    %55 = arith.addf %53, %54 : vector<2x32xf32>
    %56 = math.tanh %55 : vector<2x32xf32>
    %57 = arith.truncf %56 : vector<2x32xf32> to vector<2x32xbf16>
    %c0_18 = arith.constant 0 : index
    %c0_19 = arith.constant 0 : index
    %58 = vector.load %arg7[%c0_18, %c0_19] : memref<32x16xbf16, #tpu.memory_space<vmem>>, vector<32x16xbf16>
    %cst_20 = arith.constant dense<0.000000e+00> : vector<2x16xf32>
    %59 = tpu.matmul %57, %58, %cst_20 {dimension_numbers = #tpu.dot_dimension_numbers<[1], [0], [0], [1], [0, 0, 1, 1], [], []>} : vector<2x32xbf16>, vector<32x16xbf16>, vector<2x16xf32> -> vector<2x16xf32>
    %60 = vector.broadcast %10 : vector<1x16xf32> to vector<2x16xf32>
    %61 = arith.addf %59, %60 : vector<2x16xf32>
    %cst_21 = arith.constant dense<0xFF800000> : vector<2xf32>
    %62 = vector.multi_reduction <maximumf>, %61, %cst_21 [1] : vector<2x16xf32> to vector<2xf32>
    %63 = vector.shape_cast %62 : vector<2xf32> to vector<2x1xf32>
    %64 = vector.broadcast %63 : vector<2x1xf32> to vector<2x16xf32>
    %65 = arith.cmpf oge, %61, %64 : vector<2x16xf32>
    %c16_i32 = arith.constant 16 : i32
    %66 = vector.broadcast %c16_i32 : i32 to vector<2x16xi32>
    %67 = arith.select %65, %11, %66 : vector<2x16xi1>, vector<2x16xi32>
    %cst_22 = arith.constant dense<2147483647> : vector<2xi32>
    %68 = vector.multi_reduction <minsi>, %67, %cst_22 [1] : vector<2x16xi32> to vector<2xi32>
    %69 = vector.shape_cast %68 : vector<2xi32> to vector<2x1xi32>
    %70 = vector.broadcast %69 : vector<2x1xi32> to vector<2x16xi32>
    %71 = arith.cmpi eq, %11, %70 : vector<2x16xi32>
    %72 = arith.extui %71 : vector<2x16xi1> to vector<2x16xi32>
    %73 = arith.sitofp %72 : vector<2x16xi32> to vector<2x16xf32>
    %74 = arith.truncf %73 : vector<2x16xf32> to vector<2x16xbf16>
    %c0_23 = arith.constant 0 : index
    %c0_24 = arith.constant 0 : index
    %75 = vector.load %arg2[%c0_23, %c0_24] : memref<16x128xbf16, #tpu.memory_space<vmem>>, vector<16x128xbf16>
    %cst_25 = arith.constant dense<0.000000e+00> : vector<2x128xf32>
    %76 = tpu.matmul %74, %75, %cst_25 {dimension_numbers = #tpu.dot_dimension_numbers<[1], [0], [0], [1], [0, 0, 1, 1], [], []>} : vector<2x16xbf16>, vector<16x128xbf16>, vector<2x128xf32> -> vector<2x128xf32>
    %77 = arith.addf %76, %7 : vector<2x128xf32>
    %78 = vector.extract_strided_slice %77 {offsets = [0, 0], sizes = [2, 32], strides = [1, 1]} : vector<2x128xf32> to vector<2x32xf32>
    %79 = vector.extract_strided_slice %52 {offsets = [0, 0], sizes = [2, 32], strides = [1, 1]} : vector<2x96xf32> to vector<2x32xf32>
    %80 = arith.addf %78, %79 : vector<2x32xf32>
    %81 = arith.negf %80 : vector<2x32xf32>
    %82 = math.exp %81 : vector<2x32xf32>
    %cst_26 = arith.constant 1.000000e+00 : f32
    %83 = vector.broadcast %cst_26 : f32 to vector<2x32xf32>
    %84 = arith.addf %83, %82 : vector<2x32xf32>
    %85 = arith.divf %83, %84 : vector<2x32xf32>
    %86 = vector.extract_strided_slice %77 {offsets = [0, 32], sizes = [2, 32], strides = [1, 1]} : vector<2x128xf32> to vector<2x32xf32>
    %87 = vector.extract_strided_slice %52 {offsets = [0, 32], sizes = [2, 32], strides = [1, 1]} : vector<2x96xf32> to vector<2x32xf32>
    %88 = arith.addf %86, %87 : vector<2x32xf32>
    %89 = arith.negf %88 : vector<2x32xf32>
    %90 = math.exp %89 : vector<2x32xf32>
    %cst_27 = arith.constant 1.000000e+00 : f32
    %91 = vector.broadcast %cst_27 : f32 to vector<2x32xf32>
    %92 = arith.addf %91, %90 : vector<2x32xf32>
    %93 = arith.divf %91, %92 : vector<2x32xf32>
    %94 = vector.extract_strided_slice %77 {offsets = [0, 64], sizes = [2, 32], strides = [1, 1]} : vector<2x128xf32> to vector<2x32xf32>
    %95 = vector.extract_strided_slice %52 {offsets = [0, 64], sizes = [2, 32], strides = [1, 1]} : vector<2x96xf32> to vector<2x32xf32>
    %96 = vector.broadcast %9 : vector<1x32xf32> to vector<2x32xf32>
    %97 = arith.addf %95, %96 : vector<2x32xf32>
    %98 = arith.mulf %85, %97 : vector<2x32xf32>
    %99 = arith.addf %94, %98 : vector<2x32xf32>
    %100 = math.tanh %99 : vector<2x32xf32>
    %cst_28 = arith.constant 1.000000e+00 : f32
    %101 = vector.broadcast %cst_28 : f32 to vector<2x32xf32>
    %102 = arith.subf %101, %93 : vector<2x32xf32>
    %103 = arith.mulf %102, %100 : vector<2x32xf32>
    %104 = arith.mulf %93, %48 : vector<2x32xf32>
    %105 = arith.addf %103, %104 : vector<2x32xf32>
    %106 = arith.truncf %105 : vector<2x32xf32> to vector<2x32xbf16>
    %c0_29 = arith.constant 0 : index
    %c0_30 = arith.constant 0 : index
    %107 = vector.load %arg4[%c0_29, %c0_30] : memref<32x128xbf16, #tpu.memory_space<vmem>>, vector<32x128xbf16>
    %cst_31 = arith.constant dense<0.000000e+00> : vector<2x128xf32>
    %108 = tpu.matmul %106, %107, %cst_31 {dimension_numbers = #tpu.dot_dimension_numbers<[1], [0], [0], [1], [0, 0, 1, 1], [], []>} : vector<2x32xbf16>, vector<32x128xbf16>, vector<2x128xf32> -> vector<2x128xf32>
    %109 = vector.extract_strided_slice %108 {offsets = [0, 0], sizes = [2, 96], strides = [1, 1]} : vector<2x128xf32> to vector<2x96xf32>
    %110 = vector.extract_strided_slice %108 {offsets = [0, 96], sizes = [2, 32], strides = [1, 1]} : vector<2x128xf32> to vector<2x32xf32>
    %111 = vector.extract_strided_slice %77 {offsets = [0, 96], sizes = [2, 32], strides = [1, 1]} : vector<2x128xf32> to vector<2x32xf32>
    %112 = arith.addf %110, %111 : vector<2x32xf32>
    %113 = math.tanh %112 : vector<2x32xf32>
    %114 = arith.truncf %113 : vector<2x32xf32> to vector<2x32xbf16>
    %c0_32 = arith.constant 0 : index
    %c0_33 = arith.constant 0 : index
    %115 = vector.load %arg7[%c0_32, %c0_33] : memref<32x16xbf16, #tpu.memory_space<vmem>>, vector<32x16xbf16>
    %cst_34 = arith.constant dense<0.000000e+00> : vector<2x16xf32>
    %116 = tpu.matmul %114, %115, %cst_34 {dimension_numbers = #tpu.dot_dimension_numbers<[1], [0], [0], [1], [0, 0, 1, 1], [], []>} : vector<2x32xbf16>, vector<32x16xbf16>, vector<2x16xf32> -> vector<2x16xf32>
    %117 = vector.broadcast %10 : vector<1x16xf32> to vector<2x16xf32>
    %118 = arith.addf %116, %117 : vector<2x16xf32>
    %cst_35 = arith.constant dense<0xFF800000> : vector<2xf32>
    %119 = vector.multi_reduction <maximumf>, %118, %cst_35 [1] : vector<2x16xf32> to vector<2xf32>
    %120 = vector.shape_cast %119 : vector<2xf32> to vector<2x1xf32>
    %121 = vector.broadcast %120 : vector<2x1xf32> to vector<2x16xf32>
    %122 = arith.cmpf oge, %118, %121 : vector<2x16xf32>
    %c16_i32_36 = arith.constant 16 : i32
    %123 = vector.broadcast %c16_i32_36 : i32 to vector<2x16xi32>
    %124 = arith.select %122, %11, %123 : vector<2x16xi1>, vector<2x16xi32>
    %cst_37 = arith.constant dense<2147483647> : vector<2xi32>
    %125 = vector.multi_reduction <minsi>, %124, %cst_37 [1] : vector<2x16xi32> to vector<2xi32>
    %126 = vector.shape_cast %125 : vector<2xi32> to vector<2x1xi32>
    %127 = vector.broadcast %126 : vector<2x1xi32> to vector<2x16xi32>
    %128 = arith.cmpi eq, %11, %127 : vector<2x16xi32>
    %129 = arith.extui %128 : vector<2x16xi1> to vector<2x16xi32>
    %130 = arith.sitofp %129 : vector<2x16xi32> to vector<2x16xf32>
    %131 = arith.truncf %130 : vector<2x16xf32> to vector<2x16xbf16>
    %c0_38 = arith.constant 0 : index
    %c0_39 = arith.constant 0 : index
    %132 = vector.load %arg2[%c0_38, %c0_39] : memref<16x128xbf16, #tpu.memory_space<vmem>>, vector<16x128xbf16>
    %cst_40 = arith.constant dense<0.000000e+00> : vector<2x128xf32>
    %133 = tpu.matmul %131, %132, %cst_40 {dimension_numbers = #tpu.dot_dimension_numbers<[1], [0], [0], [1], [0, 0, 1, 1], [], []>} : vector<2x16xbf16>, vector<16x128xbf16>, vector<2x128xf32> -> vector<2x128xf32>
    %134 = arith.addf %133, %7 : vector<2x128xf32>
    %135 = vector.extract_strided_slice %134 {offsets = [0, 0], sizes = [2, 32], strides = [1, 1]} : vector<2x128xf32> to vector<2x32xf32>
    %136 = vector.extract_strided_slice %109 {offsets = [0, 0], sizes = [2, 32], strides = [1, 1]} : vector<2x96xf32> to vector<2x32xf32>
    %137 = arith.addf %135, %136 : vector<2x32xf32>
    %138 = arith.negf %137 : vector<2x32xf32>
    %139 = math.exp %138 : vector<2x32xf32>
    %cst_41 = arith.constant 1.000000e+00 : f32
    %140 = vector.broadcast %cst_41 : f32 to vector<2x32xf32>
    %141 = arith.addf %140, %139 : vector<2x32xf32>
    %142 = arith.divf %140, %141 : vector<2x32xf32>
    %143 = vector.extract_strided_slice %134 {offsets = [0, 32], sizes = [2, 32], strides = [1, 1]} : vector<2x128xf32> to vector<2x32xf32>
    %144 = vector.extract_strided_slice %109 {offsets = [0, 32], sizes = [2, 32], strides = [1, 1]} : vector<2x96xf32> to vector<2x32xf32>
    %145 = arith.addf %143, %144 : vector<2x32xf32>
    %146 = arith.negf %145 : vector<2x32xf32>
    %147 = math.exp %146 : vector<2x32xf32>
    %cst_42 = arith.constant 1.000000e+00 : f32
    %148 = vector.broadcast %cst_42 : f32 to vector<2x32xf32>
    %149 = arith.addf %148, %147 : vector<2x32xf32>
    %150 = arith.divf %148, %149 : vector<2x32xf32>
    %151 = vector.extract_strided_slice %134 {offsets = [0, 64], sizes = [2, 32], strides = [1, 1]} : vector<2x128xf32> to vector<2x32xf32>
    %152 = vector.extract_strided_slice %109 {offsets = [0, 64], sizes = [2, 32], strides = [1, 1]} : vector<2x96xf32> to vector<2x32xf32>
    %153 = vector.broadcast %9 : vector<1x32xf32> to vector<2x32xf32>
    %154 = arith.addf %152, %153 : vector<2x32xf32>
    %155 = arith.mulf %142, %154 : vector<2x32xf32>
    %156 = arith.addf %151, %155 : vector<2x32xf32>
    %157 = math.tanh %156 : vector<2x32xf32>
    %cst_43 = arith.constant 1.000000e+00 : f32
    %158 = vector.broadcast %cst_43 : f32 to vector<2x32xf32>
    %159 = arith.subf %158, %150 : vector<2x32xf32>
    %160 = arith.mulf %159, %157 : vector<2x32xf32>
    %161 = arith.mulf %150, %105 : vector<2x32xf32>
    %162 = arith.addf %160, %161 : vector<2x32xf32>
    %163 = arith.truncf %162 : vector<2x32xf32> to vector<2x32xbf16>
    %c0_44 = arith.constant 0 : index
    %c0_45 = arith.constant 0 : index
    %164 = vector.load %arg4[%c0_44, %c0_45] : memref<32x128xbf16, #tpu.memory_space<vmem>>, vector<32x128xbf16>
    %cst_46 = arith.constant dense<0.000000e+00> : vector<2x128xf32>
    %165 = tpu.matmul %163, %164, %cst_46 {dimension_numbers = #tpu.dot_dimension_numbers<[1], [0], [0], [1], [0, 0, 1, 1], [], []>} : vector<2x32xbf16>, vector<32x128xbf16>, vector<2x128xf32> -> vector<2x128xf32>
    %166 = vector.extract_strided_slice %165 {offsets = [0, 0], sizes = [2, 96], strides = [1, 1]} : vector<2x128xf32> to vector<2x96xf32>
    %167 = vector.extract_strided_slice %165 {offsets = [0, 96], sizes = [2, 32], strides = [1, 1]} : vector<2x128xf32> to vector<2x32xf32>
    %168 = vector.extract_strided_slice %134 {offsets = [0, 96], sizes = [2, 32], strides = [1, 1]} : vector<2x128xf32> to vector<2x32xf32>
    %169 = arith.addf %167, %168 : vector<2x32xf32>
    %170 = math.tanh %169 : vector<2x32xf32>
    %171 = arith.truncf %170 : vector<2x32xf32> to vector<2x32xbf16>
    %c0_47 = arith.constant 0 : index
    %c0_48 = arith.constant 0 : index
    %172 = vector.load %arg7[%c0_47, %c0_48] : memref<32x16xbf16, #tpu.memory_space<vmem>>, vector<32x16xbf16>
    %cst_49 = arith.constant dense<0.000000e+00> : vector<2x16xf32>
    %173 = tpu.matmul %171, %172, %cst_49 {dimension_numbers = #tpu.dot_dimension_numbers<[1], [0], [0], [1], [0, 0, 1, 1], [], []>} : vector<2x32xbf16>, vector<32x16xbf16>, vector<2x16xf32> -> vector<2x16xf32>
    %174 = vector.broadcast %10 : vector<1x16xf32> to vector<2x16xf32>
    %175 = arith.addf %173, %174 : vector<2x16xf32>
    %cst_50 = arith.constant dense<0xFF800000> : vector<2xf32>
    %176 = vector.multi_reduction <maximumf>, %175, %cst_50 [1] : vector<2x16xf32> to vector<2xf32>
    %177 = vector.shape_cast %176 : vector<2xf32> to vector<2x1xf32>
    %178 = vector.broadcast %177 : vector<2x1xf32> to vector<2x16xf32>
    %179 = arith.cmpf oge, %175, %178 : vector<2x16xf32>
    %c16_i32_51 = arith.constant 16 : i32
    %180 = vector.broadcast %c16_i32_51 : i32 to vector<2x16xi32>
    %181 = arith.select %179, %11, %180 : vector<2x16xi1>, vector<2x16xi32>
    %cst_52 = arith.constant dense<2147483647> : vector<2xi32>
    %182 = vector.multi_reduction <minsi>, %181, %cst_52 [1] : vector<2x16xi32> to vector<2xi32>
    %183 = vector.shape_cast %182 : vector<2xi32> to vector<2x1xi32>
    %184 = vector.broadcast %183 : vector<2x1xi32> to vector<2x16xi32>
    %185 = arith.cmpi eq, %11, %184 : vector<2x16xi32>
    %186 = arith.extui %185 : vector<2x16xi1> to vector<2x16xi32>
    %187 = arith.sitofp %186 : vector<2x16xi32> to vector<2x16xf32>
    %188 = arith.truncf %187 : vector<2x16xf32> to vector<2x16xbf16>
    %c0_53 = arith.constant 0 : index
    %c0_54 = arith.constant 0 : index
    %189 = vector.load %arg2[%c0_53, %c0_54] : memref<16x128xbf16, #tpu.memory_space<vmem>>, vector<16x128xbf16>
    %cst_55 = arith.constant dense<0.000000e+00> : vector<2x128xf32>
    %190 = tpu.matmul %188, %189, %cst_55 {dimension_numbers = #tpu.dot_dimension_numbers<[1], [0], [0], [1], [0, 0, 1, 1], [], []>} : vector<2x16xbf16>, vector<16x128xbf16>, vector<2x128xf32> -> vector<2x128xf32>
    %191 = arith.addf %190, %7 : vector<2x128xf32>
    %192 = vector.extract_strided_slice %191 {offsets = [0, 0], sizes = [2, 32], strides = [1, 1]} : vector<2x128xf32> to vector<2x32xf32>
    %193 = vector.extract_strided_slice %166 {offsets = [0, 0], sizes = [2, 32], strides = [1, 1]} : vector<2x96xf32> to vector<2x32xf32>
    %194 = arith.addf %192, %193 : vector<2x32xf32>
    %195 = arith.negf %194 : vector<2x32xf32>
    %196 = math.exp %195 : vector<2x32xf32>
    %cst_56 = arith.constant 1.000000e+00 : f32
    %197 = vector.broadcast %cst_56 : f32 to vector<2x32xf32>
    %198 = arith.addf %197, %196 : vector<2x32xf32>
    %199 = arith.divf %197, %198 : vector<2x32xf32>
    %200 = vector.extract_strided_slice %191 {offsets = [0, 32], sizes = [2, 32], strides = [1, 1]} : vector<2x128xf32> to vector<2x32xf32>
    %201 = vector.extract_strided_slice %166 {offsets = [0, 32], sizes = [2, 32], strides = [1, 1]} : vector<2x96xf32> to vector<2x32xf32>
    %202 = arith.addf %200, %201 : vector<2x32xf32>
    %203 = arith.negf %202 : vector<2x32xf32>
    %204 = math.exp %203 : vector<2x32xf32>
    %cst_57 = arith.constant 1.000000e+00 : f32
    %205 = vector.broadcast %cst_57 : f32 to vector<2x32xf32>
    %206 = arith.addf %205, %204 : vector<2x32xf32>
    %207 = arith.divf %205, %206 : vector<2x32xf32>
    %208 = vector.extract_strided_slice %191 {offsets = [0, 64], sizes = [2, 32], strides = [1, 1]} : vector<2x128xf32> to vector<2x32xf32>
    %209 = vector.extract_strided_slice %166 {offsets = [0, 64], sizes = [2, 32], strides = [1, 1]} : vector<2x96xf32> to vector<2x32xf32>
    %210 = vector.broadcast %9 : vector<1x32xf32> to vector<2x32xf32>
    %211 = arith.addf %209, %210 : vector<2x32xf32>
    %212 = arith.mulf %199, %211 : vector<2x32xf32>
    %213 = arith.addf %208, %212 : vector<2x32xf32>
    %214 = math.tanh %213 : vector<2x32xf32>
    %cst_58 = arith.constant 1.000000e+00 : f32
    %215 = vector.broadcast %cst_58 : f32 to vector<2x32xf32>
    %216 = arith.subf %215, %207 : vector<2x32xf32>
    %217 = arith.mulf %216, %214 : vector<2x32xf32>
    %218 = arith.mulf %207, %162 : vector<2x32xf32>
    %219 = arith.addf %217, %218 : vector<2x32xf32>
    %220 = arith.truncf %219 : vector<2x32xf32> to vector<2x32xbf16>
    %c0_59 = arith.constant 0 : index
    %c0_60 = arith.constant 0 : index
    %221 = vector.load %arg4[%c0_59, %c0_60] : memref<32x128xbf16, #tpu.memory_space<vmem>>, vector<32x128xbf16>
    %cst_61 = arith.constant dense<0.000000e+00> : vector<2x128xf32>
    %222 = tpu.matmul %220, %221, %cst_61 {dimension_numbers = #tpu.dot_dimension_numbers<[1], [0], [0], [1], [0, 0, 1, 1], [], []>} : vector<2x32xbf16>, vector<32x128xbf16>, vector<2x128xf32> -> vector<2x128xf32>
    %223 = vector.extract_strided_slice %222 {offsets = [0, 0], sizes = [2, 96], strides = [1, 1]} : vector<2x128xf32> to vector<2x96xf32>
    %224 = vector.extract_strided_slice %222 {offsets = [0, 96], sizes = [2, 32], strides = [1, 1]} : vector<2x128xf32> to vector<2x32xf32>
    %225 = vector.extract_strided_slice %191 {offsets = [0, 96], sizes = [2, 32], strides = [1, 1]} : vector<2x128xf32> to vector<2x32xf32>
    %226 = arith.addf %224, %225 : vector<2x32xf32>
    %227 = math.tanh %226 : vector<2x32xf32>
    %228 = arith.truncf %227 : vector<2x32xf32> to vector<2x32xbf16>
    %c0_62 = arith.constant 0 : index
    %c0_63 = arith.constant 0 : index
    %229 = vector.load %arg7[%c0_62, %c0_63] : memref<32x16xbf16, #tpu.memory_space<vmem>>, vector<32x16xbf16>
    %cst_64 = arith.constant dense<0.000000e+00> : vector<2x16xf32>
    %230 = tpu.matmul %228, %229, %cst_64 {dimension_numbers = #tpu.dot_dimension_numbers<[1], [0], [0], [1], [0, 0, 1, 1], [], []>} : vector<2x32xbf16>, vector<32x16xbf16>, vector<2x16xf32> -> vector<2x16xf32>
    %231 = vector.broadcast %10 : vector<1x16xf32> to vector<2x16xf32>
    %232 = arith.addf %230, %231 : vector<2x16xf32>
    %cst_65 = arith.constant dense<0xFF800000> : vector<2xf32>
    %233 = vector.multi_reduction <maximumf>, %232, %cst_65 [1] : vector<2x16xf32> to vector<2xf32>
    %234 = vector.shape_cast %233 : vector<2xf32> to vector<2x1xf32>
    %235 = vector.broadcast %234 : vector<2x1xf32> to vector<2x16xf32>
    %236 = arith.cmpf oge, %232, %235 : vector<2x16xf32>
    %c16_i32_66 = arith.constant 16 : i32
    %237 = vector.broadcast %c16_i32_66 : i32 to vector<2x16xi32>
    %238 = arith.select %236, %11, %237 : vector<2x16xi1>, vector<2x16xi32>
    %cst_67 = arith.constant dense<2147483647> : vector<2xi32>
    %239 = vector.multi_reduction <minsi>, %238, %cst_67 [1] : vector<2x16xi32> to vector<2xi32>
    %240 = vector.shape_cast %239 : vector<2xi32> to vector<2x1xi32>
    %241 = vector.broadcast %240 : vector<2x1xi32> to vector<2x16xi32>
    %242 = arith.cmpi eq, %11, %241 : vector<2x16xi32>
    %243 = arith.extui %242 : vector<2x16xi1> to vector<2x16xi32>
    %244 = arith.sitofp %243 : vector<2x16xi32> to vector<2x16xf32>
    %245 = arith.truncf %244 : vector<2x16xf32> to vector<2x16xbf16>
    %c0_68 = arith.constant 0 : index
    %c0_69 = arith.constant 0 : index
    %246 = vector.load %arg2[%c0_68, %c0_69] : memref<16x128xbf16, #tpu.memory_space<vmem>>, vector<16x128xbf16>
    %cst_70 = arith.constant dense<0.000000e+00> : vector<2x128xf32>
    %247 = tpu.matmul %245, %246, %cst_70 {dimension_numbers = #tpu.dot_dimension_numbers<[1], [0], [0], [1], [0, 0, 1, 1], [], []>} : vector<2x16xbf16>, vector<16x128xbf16>, vector<2x128xf32> -> vector<2x128xf32>
    %248 = arith.addf %247, %7 : vector<2x128xf32>
    %249 = vector.extract_strided_slice %248 {offsets = [0, 0], sizes = [2, 32], strides = [1, 1]} : vector<2x128xf32> to vector<2x32xf32>
    %250 = vector.extract_strided_slice %223 {offsets = [0, 0], sizes = [2, 32], strides = [1, 1]} : vector<2x96xf32> to vector<2x32xf32>
    %251 = arith.addf %249, %250 : vector<2x32xf32>
    %252 = arith.negf %251 : vector<2x32xf32>
    %253 = math.exp %252 : vector<2x32xf32>
    %cst_71 = arith.constant 1.000000e+00 : f32
    %254 = vector.broadcast %cst_71 : f32 to vector<2x32xf32>
    %255 = arith.addf %254, %253 : vector<2x32xf32>
    %256 = arith.divf %254, %255 : vector<2x32xf32>
    %257 = vector.extract_strided_slice %248 {offsets = [0, 32], sizes = [2, 32], strides = [1, 1]} : vector<2x128xf32> to vector<2x32xf32>
    %258 = vector.extract_strided_slice %223 {offsets = [0, 32], sizes = [2, 32], strides = [1, 1]} : vector<2x96xf32> to vector<2x32xf32>
    %259 = arith.addf %257, %258 : vector<2x32xf32>
    %260 = arith.negf %259 : vector<2x32xf32>
    %261 = math.exp %260 : vector<2x32xf32>
    %cst_72 = arith.constant 1.000000e+00 : f32
    %262 = vector.broadcast %cst_72 : f32 to vector<2x32xf32>
    %263 = arith.addf %262, %261 : vector<2x32xf32>
    %264 = arith.divf %262, %263 : vector<2x32xf32>
    %265 = vector.extract_strided_slice %248 {offsets = [0, 64], sizes = [2, 32], strides = [1, 1]} : vector<2x128xf32> to vector<2x32xf32>
    %266 = vector.extract_strided_slice %223 {offsets = [0, 64], sizes = [2, 32], strides = [1, 1]} : vector<2x96xf32> to vector<2x32xf32>
    %267 = vector.broadcast %9 : vector<1x32xf32> to vector<2x32xf32>
    %268 = arith.addf %266, %267 : vector<2x32xf32>
    %269 = arith.mulf %256, %268 : vector<2x32xf32>
    %270 = arith.addf %265, %269 : vector<2x32xf32>
    %271 = math.tanh %270 : vector<2x32xf32>
    %cst_73 = arith.constant 1.000000e+00 : f32
    %272 = vector.broadcast %cst_73 : f32 to vector<2x32xf32>
    %273 = arith.subf %272, %264 : vector<2x32xf32>
    %274 = arith.mulf %273, %271 : vector<2x32xf32>
    %275 = arith.mulf %264, %219 : vector<2x32xf32>
    %276 = arith.addf %274, %275 : vector<2x32xf32>
    %277 = arith.truncf %276 : vector<2x32xf32> to vector<2x32xbf16>
    %c0_74 = arith.constant 0 : index
    %c0_75 = arith.constant 0 : index
    %278 = vector.load %arg4[%c0_74, %c0_75] : memref<32x128xbf16, #tpu.memory_space<vmem>>, vector<32x128xbf16>
    %cst_76 = arith.constant dense<0.000000e+00> : vector<2x128xf32>
    %279 = tpu.matmul %277, %278, %cst_76 {dimension_numbers = #tpu.dot_dimension_numbers<[1], [0], [0], [1], [0, 0, 1, 1], [], []>} : vector<2x32xbf16>, vector<32x128xbf16>, vector<2x128xf32> -> vector<2x128xf32>
    %280 = vector.extract_strided_slice %279 {offsets = [0, 0], sizes = [2, 96], strides = [1, 1]} : vector<2x128xf32> to vector<2x96xf32>
    %281 = vector.extract_strided_slice %279 {offsets = [0, 96], sizes = [2, 32], strides = [1, 1]} : vector<2x128xf32> to vector<2x32xf32>
    %282 = vector.extract_strided_slice %248 {offsets = [0, 96], sizes = [2, 32], strides = [1, 1]} : vector<2x128xf32> to vector<2x32xf32>
    %283 = arith.addf %281, %282 : vector<2x32xf32>
    %284 = math.tanh %283 : vector<2x32xf32>
    %285 = arith.truncf %284 : vector<2x32xf32> to vector<2x32xbf16>
    %c0_77 = arith.constant 0 : index
    %c0_78 = arith.constant 0 : index
    %286 = vector.load %arg7[%c0_77, %c0_78] : memref<32x16xbf16, #tpu.memory_space<vmem>>, vector<32x16xbf16>
    %cst_79 = arith.constant dense<0.000000e+00> : vector<2x16xf32>
    %287 = tpu.matmul %285, %286, %cst_79 {dimension_numbers = #tpu.dot_dimension_numbers<[1], [0], [0], [1], [0, 0, 1, 1], [], []>} : vector<2x32xbf16>, vector<32x16xbf16>, vector<2x16xf32> -> vector<2x16xf32>
    %288 = vector.broadcast %10 : vector<1x16xf32> to vector<2x16xf32>
    %289 = arith.addf %287, %288 : vector<2x16xf32>
    %cst_80 = arith.constant dense<0xFF800000> : vector<2xf32>
    %290 = vector.multi_reduction <maximumf>, %289, %cst_80 [1] : vector<2x16xf32> to vector<2xf32>
    %291 = vector.shape_cast %290 : vector<2xf32> to vector<2x1xf32>
    %292 = vector.broadcast %291 : vector<2x1xf32> to vector<2x16xf32>
    %293 = arith.cmpf oge, %289, %292 : vector<2x16xf32>
    %c16_i32_81 = arith.constant 16 : i32
    %294 = vector.broadcast %c16_i32_81 : i32 to vector<2x16xi32>
    %295 = arith.select %293, %11, %294 : vector<2x16xi1>, vector<2x16xi32>
    %cst_82 = arith.constant dense<2147483647> : vector<2xi32>
    %296 = vector.multi_reduction <minsi>, %295, %cst_82 [1] : vector<2x16xi32> to vector<2xi32>
    %297 = vector.shape_cast %296 : vector<2xi32> to vector<2x1xi32>
    %298 = vector.broadcast %297 : vector<2x1xi32> to vector<2x16xi32>
    %299 = arith.cmpi eq, %11, %298 : vector<2x16xi32>
    %300 = arith.extui %299 : vector<2x16xi1> to vector<2x16xi32>
    %301 = arith.sitofp %300 : vector<2x16xi32> to vector<2x16xf32>
    %302 = arith.truncf %301 : vector<2x16xf32> to vector<2x16xbf16>
    %c0_83 = arith.constant 0 : index
    %c0_84 = arith.constant 0 : index
    %303 = vector.load %arg2[%c0_83, %c0_84] : memref<16x128xbf16, #tpu.memory_space<vmem>>, vector<16x128xbf16>
    %cst_85 = arith.constant dense<0.000000e+00> : vector<2x128xf32>
    %304 = tpu.matmul %302, %303, %cst_85 {dimension_numbers = #tpu.dot_dimension_numbers<[1], [0], [0], [1], [0, 0, 1, 1], [], []>} : vector<2x16xbf16>, vector<16x128xbf16>, vector<2x128xf32> -> vector<2x128xf32>
    %305 = arith.addf %304, %7 : vector<2x128xf32>
    %306 = vector.extract_strided_slice %305 {offsets = [0, 0], sizes = [2, 32], strides = [1, 1]} : vector<2x128xf32> to vector<2x32xf32>
    %307 = vector.extract_strided_slice %280 {offsets = [0, 0], sizes = [2, 32], strides = [1, 1]} : vector<2x96xf32> to vector<2x32xf32>
    %308 = arith.addf %306, %307 : vector<2x32xf32>
    %309 = arith.negf %308 : vector<2x32xf32>
    %310 = math.exp %309 : vector<2x32xf32>
    %cst_86 = arith.constant 1.000000e+00 : f32
    %311 = vector.broadcast %cst_86 : f32 to vector<2x32xf32>
    %312 = arith.addf %311, %310 : vector<2x32xf32>
    %313 = arith.divf %311, %312 : vector<2x32xf32>
    %314 = vector.extract_strided_slice %305 {offsets = [0, 32], sizes = [2, 32], strides = [1, 1]} : vector<2x128xf32> to vector<2x32xf32>
    %315 = vector.extract_strided_slice %280 {offsets = [0, 32], sizes = [2, 32], strides = [1, 1]} : vector<2x96xf32> to vector<2x32xf32>
    %316 = arith.addf %314, %315 : vector<2x32xf32>
    %317 = arith.negf %316 : vector<2x32xf32>
    %318 = math.exp %317 : vector<2x32xf32>
    %cst_87 = arith.constant 1.000000e+00 : f32
    %319 = vector.broadcast %cst_87 : f32 to vector<2x32xf32>
    %320 = arith.addf %319, %318 : vector<2x32xf32>
    %321 = arith.divf %319, %320 : vector<2x32xf32>
    %322 = vector.extract_strided_slice %305 {offsets = [0, 64], sizes = [2, 32], strides = [1, 1]} : vector<2x128xf32> to vector<2x32xf32>
    %323 = vector.extract_strided_slice %280 {offsets = [0, 64], sizes = [2, 32], strides = [1, 1]} : vector<2x96xf32> to vector<2x32xf32>
    %324 = vector.broadcast %9 : vector<1x32xf32> to vector<2x32xf32>
    %325 = arith.addf %323, %324 : vector<2x32xf32>
    %326 = arith.mulf %313, %325 : vector<2x32xf32>
    %327 = arith.addf %322, %326 : vector<2x32xf32>
    %328 = math.tanh %327 : vector<2x32xf32>
    %cst_88 = arith.constant 1.000000e+00 : f32
    %329 = vector.broadcast %cst_88 : f32 to vector<2x32xf32>
    %330 = arith.subf %329, %321 : vector<2x32xf32>
    %331 = arith.mulf %330, %328 : vector<2x32xf32>
    %332 = arith.mulf %321, %276 : vector<2x32xf32>
    %333 = arith.addf %331, %332 : vector<2x32xf32>
    %334 = arith.truncf %333 : vector<2x32xf32> to vector<2x32xbf16>
    %c0_89 = arith.constant 0 : index
    %c0_90 = arith.constant 0 : index
    %335 = vector.load %arg4[%c0_89, %c0_90] : memref<32x128xbf16, #tpu.memory_space<vmem>>, vector<32x128xbf16>
    %cst_91 = arith.constant dense<0.000000e+00> : vector<2x128xf32>
    %336 = tpu.matmul %334, %335, %cst_91 {dimension_numbers = #tpu.dot_dimension_numbers<[1], [0], [0], [1], [0, 0, 1, 1], [], []>} : vector<2x32xbf16>, vector<32x128xbf16>, vector<2x128xf32> -> vector<2x128xf32>
    %337 = vector.extract_strided_slice %336 {offsets = [0, 0], sizes = [2, 96], strides = [1, 1]} : vector<2x128xf32> to vector<2x96xf32>
    %338 = vector.extract_strided_slice %336 {offsets = [0, 96], sizes = [2, 32], strides = [1, 1]} : vector<2x128xf32> to vector<2x32xf32>
    %339 = vector.extract_strided_slice %305 {offsets = [0, 96], sizes = [2, 32], strides = [1, 1]} : vector<2x128xf32> to vector<2x32xf32>
    %340 = arith.addf %338, %339 : vector<2x32xf32>
    %341 = math.tanh %340 : vector<2x32xf32>
    %342 = arith.truncf %341 : vector<2x32xf32> to vector<2x32xbf16>
    %c0_92 = arith.constant 0 : index
    %c0_93 = arith.constant 0 : index
    %343 = vector.load %arg7[%c0_92, %c0_93] : memref<32x16xbf16, #tpu.memory_space<vmem>>, vector<32x16xbf16>
    %cst_94 = arith.constant dense<0.000000e+00> : vector<2x16xf32>
    %344 = tpu.matmul %342, %343, %cst_94 {dimension_numbers = #tpu.dot_dimension_numbers<[1], [0], [0], [1], [0, 0, 1, 1], [], []>} : vector<2x32xbf16>, vector<32x16xbf16>, vector<2x16xf32> -> vector<2x16xf32>
    %345 = vector.broadcast %10 : vector<1x16xf32> to vector<2x16xf32>
    %346 = arith.addf %344, %345 : vector<2x16xf32>
    %cst_95 = arith.constant dense<0xFF800000> : vector<2xf32>
    %347 = vector.multi_reduction <maximumf>, %346, %cst_95 [1] : vector<2x16xf32> to vector<2xf32>
    %348 = vector.shape_cast %347 : vector<2xf32> to vector<2x1xf32>
    %349 = vector.broadcast %348 : vector<2x1xf32> to vector<2x16xf32>
    %350 = arith.cmpf oge, %346, %349 : vector<2x16xf32>
    %c16_i32_96 = arith.constant 16 : i32
    %351 = vector.broadcast %c16_i32_96 : i32 to vector<2x16xi32>
    %352 = arith.select %350, %11, %351 : vector<2x16xi1>, vector<2x16xi32>
    %cst_97 = arith.constant dense<2147483647> : vector<2xi32>
    %353 = vector.multi_reduction <minsi>, %352, %cst_97 [1] : vector<2x16xi32> to vector<2xi32>
    %354 = vector.shape_cast %353 : vector<2xi32> to vector<2x1xi32>
    %355 = vector.broadcast %354 : vector<2x1xi32> to vector<2x16xi32>
    %356 = arith.cmpi eq, %11, %355 : vector<2x16xi32>
    %357 = arith.extui %356 : vector<2x16xi1> to vector<2x16xi32>
    %358 = arith.sitofp %357 : vector<2x16xi32> to vector<2x16xf32>
    %359 = arith.truncf %358 : vector<2x16xf32> to vector<2x16xbf16>
    %c0_98 = arith.constant 0 : index
    %c0_99 = arith.constant 0 : index
    %360 = vector.load %arg2[%c0_98, %c0_99] : memref<16x128xbf16, #tpu.memory_space<vmem>>, vector<16x128xbf16>
    %cst_100 = arith.constant dense<0.000000e+00> : vector<2x128xf32>
    %361 = tpu.matmul %359, %360, %cst_100 {dimension_numbers = #tpu.dot_dimension_numbers<[1], [0], [0], [1], [0, 0, 1, 1], [], []>} : vector<2x16xbf16>, vector<16x128xbf16>, vector<2x128xf32> -> vector<2x128xf32>
    %362 = arith.addf %361, %7 : vector<2x128xf32>
    %363 = vector.extract_strided_slice %362 {offsets = [0, 0], sizes = [2, 32], strides = [1, 1]} : vector<2x128xf32> to vector<2x32xf32>
    %364 = vector.extract_strided_slice %337 {offsets = [0, 0], sizes = [2, 32], strides = [1, 1]} : vector<2x96xf32> to vector<2x32xf32>
    %365 = arith.addf %363, %364 : vector<2x32xf32>
    %366 = arith.negf %365 : vector<2x32xf32>
    %367 = math.exp %366 : vector<2x32xf32>
    %cst_101 = arith.constant 1.000000e+00 : f32
    %368 = vector.broadcast %cst_101 : f32 to vector<2x32xf32>
    %369 = arith.addf %368, %367 : vector<2x32xf32>
    %370 = arith.divf %368, %369 : vector<2x32xf32>
    %371 = vector.extract_strided_slice %362 {offsets = [0, 32], sizes = [2, 32], strides = [1, 1]} : vector<2x128xf32> to vector<2x32xf32>
    %372 = vector.extract_strided_slice %337 {offsets = [0, 32], sizes = [2, 32], strides = [1, 1]} : vector<2x96xf32> to vector<2x32xf32>
    %373 = arith.addf %371, %372 : vector<2x32xf32>
    %374 = arith.negf %373 : vector<2x32xf32>
    %375 = math.exp %374 : vector<2x32xf32>
    %cst_102 = arith.constant 1.000000e+00 : f32
    %376 = vector.broadcast %cst_102 : f32 to vector<2x32xf32>
    %377 = arith.addf %376, %375 : vector<2x32xf32>
    %378 = arith.divf %376, %377 : vector<2x32xf32>
    %379 = vector.extract_strided_slice %362 {offsets = [0, 64], sizes = [2, 32], strides = [1, 1]} : vector<2x128xf32> to vector<2x32xf32>
    %380 = vector.extract_strided_slice %337 {offsets = [0, 64], sizes = [2, 32], strides = [1, 1]} : vector<2x96xf32> to vector<2x32xf32>
    %381 = vector.broadcast %9 : vector<1x32xf32> to vector<2x32xf32>
    %382 = arith.addf %380, %381 : vector<2x32xf32>
    %383 = arith.mulf %370, %382 : vector<2x32xf32>
    %384 = arith.addf %379, %383 : vector<2x32xf32>
    %385 = math.tanh %384 : vector<2x32xf32>
    %cst_103 = arith.constant 1.000000e+00 : f32
    %386 = vector.broadcast %cst_103 : f32 to vector<2x32xf32>
    %387 = arith.subf %386, %378 : vector<2x32xf32>
    %388 = arith.mulf %387, %385 : vector<2x32xf32>
    %389 = arith.mulf %378, %333 : vector<2x32xf32>
    %390 = arith.addf %388, %389 : vector<2x32xf32>
    %391 = arith.truncf %390 : vector<2x32xf32> to vector<2x32xbf16>
    %c0_104 = arith.constant 0 : index
    %c0_105 = arith.constant 0 : index
    %392 = vector.load %arg4[%c0_104, %c0_105] : memref<32x128xbf16, #tpu.memory_space<vmem>>, vector<32x128xbf16>
    %cst_106 = arith.constant dense<0.000000e+00> : vector<2x128xf32>
    %393 = tpu.matmul %391, %392, %cst_106 {dimension_numbers = #tpu.dot_dimension_numbers<[1], [0], [0], [1], [0, 0, 1, 1], [], []>} : vector<2x32xbf16>, vector<32x128xbf16>, vector<2x128xf32> -> vector<2x128xf32>
    %394 = vector.extract_strided_slice %393 {offsets = [0, 0], sizes = [2, 96], strides = [1, 1]} : vector<2x128xf32> to vector<2x96xf32>
    %395 = vector.extract_strided_slice %393 {offsets = [0, 96], sizes = [2, 32], strides = [1, 1]} : vector<2x128xf32> to vector<2x32xf32>
    %396 = vector.extract_strided_slice %362 {offsets = [0, 96], sizes = [2, 32], strides = [1, 1]} : vector<2x128xf32> to vector<2x32xf32>
    %397 = arith.addf %395, %396 : vector<2x32xf32>
    %398 = math.tanh %397 : vector<2x32xf32>
    %399 = arith.truncf %398 : vector<2x32xf32> to vector<2x32xbf16>
    %c0_107 = arith.constant 0 : index
    %c0_108 = arith.constant 0 : index
    %400 = vector.load %arg7[%c0_107, %c0_108] : memref<32x16xbf16, #tpu.memory_space<vmem>>, vector<32x16xbf16>
    %cst_109 = arith.constant dense<0.000000e+00> : vector<2x16xf32>
    %401 = tpu.matmul %399, %400, %cst_109 {dimension_numbers = #tpu.dot_dimension_numbers<[1], [0], [0], [1], [0, 0, 1, 1], [], []>} : vector<2x32xbf16>, vector<32x16xbf16>, vector<2x16xf32> -> vector<2x16xf32>
    %402 = vector.broadcast %10 : vector<1x16xf32> to vector<2x16xf32>
    %403 = arith.addf %401, %402 : vector<2x16xf32>
    %cst_110 = arith.constant dense<0xFF800000> : vector<2xf32>
    %404 = vector.multi_reduction <maximumf>, %403, %cst_110 [1] : vector<2x16xf32> to vector<2xf32>
    %405 = vector.shape_cast %404 : vector<2xf32> to vector<2x1xf32>
    %406 = vector.broadcast %405 : vector<2x1xf32> to vector<2x16xf32>
    %407 = arith.cmpf oge, %403, %406 : vector<2x16xf32>
    %c16_i32_111 = arith.constant 16 : i32
    %408 = vector.broadcast %c16_i32_111 : i32 to vector<2x16xi32>
    %409 = arith.select %407, %11, %408 : vector<2x16xi1>, vector<2x16xi32>
    %cst_112 = arith.constant dense<2147483647> : vector<2xi32>
    %410 = vector.multi_reduction <minsi>, %409, %cst_112 [1] : vector<2x16xi32> to vector<2xi32>
    %411 = vector.shape_cast %410 : vector<2xi32> to vector<2x1xi32>
    %412 = vector.broadcast %411 : vector<2x1xi32> to vector<2x16xi32>
    %413 = arith.cmpi eq, %11, %412 : vector<2x16xi32>
    %414 = arith.extui %413 : vector<2x16xi1> to vector<2x16xi32>
    %415 = arith.sitofp %414 : vector<2x16xi32> to vector<2x16xf32>
    %416 = arith.truncf %415 : vector<2x16xf32> to vector<2x16xbf16>
    %c0_113 = arith.constant 0 : index
    %c0_114 = arith.constant 0 : index
    %417 = vector.load %arg2[%c0_113, %c0_114] : memref<16x128xbf16, #tpu.memory_space<vmem>>, vector<16x128xbf16>
    %cst_115 = arith.constant dense<0.000000e+00> : vector<2x128xf32>
    %418 = tpu.matmul %416, %417, %cst_115 {dimension_numbers = #tpu.dot_dimension_numbers<[1], [0], [0], [1], [0, 0, 1, 1], [], []>} : vector<2x16xbf16>, vector<16x128xbf16>, vector<2x128xf32> -> vector<2x128xf32>
    %419 = arith.addf %418, %7 : vector<2x128xf32>
    %420 = vector.extract_strided_slice %419 {offsets = [0, 0], sizes = [2, 32], strides = [1, 1]} : vector<2x128xf32> to vector<2x32xf32>
    %421 = vector.extract_strided_slice %394 {offsets = [0, 0], sizes = [2, 32], strides = [1, 1]} : vector<2x96xf32> to vector<2x32xf32>
    %422 = arith.addf %420, %421 : vector<2x32xf32>
    %423 = arith.negf %422 : vector<2x32xf32>
    %424 = math.exp %423 : vector<2x32xf32>
    %cst_116 = arith.constant 1.000000e+00 : f32
    %425 = vector.broadcast %cst_116 : f32 to vector<2x32xf32>
    %426 = arith.addf %425, %424 : vector<2x32xf32>
    %427 = arith.divf %425, %426 : vector<2x32xf32>
    %428 = vector.extract_strided_slice %419 {offsets = [0, 32], sizes = [2, 32], strides = [1, 1]} : vector<2x128xf32> to vector<2x32xf32>
    %429 = vector.extract_strided_slice %394 {offsets = [0, 32], sizes = [2, 32], strides = [1, 1]} : vector<2x96xf32> to vector<2x32xf32>
    %430 = arith.addf %428, %429 : vector<2x32xf32>
    %431 = arith.negf %430 : vector<2x32xf32>
    %432 = math.exp %431 : vector<2x32xf32>
    %cst_117 = arith.constant 1.000000e+00 : f32
    %433 = vector.broadcast %cst_117 : f32 to vector<2x32xf32>
    %434 = arith.addf %433, %432 : vector<2x32xf32>
    %435 = arith.divf %433, %434 : vector<2x32xf32>
    %436 = vector.extract_strided_slice %419 {offsets = [0, 64], sizes = [2, 32], strides = [1, 1]} : vector<2x128xf32> to vector<2x32xf32>
    %437 = vector.extract_strided_slice %394 {offsets = [0, 64], sizes = [2, 32], strides = [1, 1]} : vector<2x96xf32> to vector<2x32xf32>
    %438 = vector.broadcast %9 : vector<1x32xf32> to vector<2x32xf32>
    %439 = arith.addf %437, %438 : vector<2x32xf32>
    %440 = arith.mulf %427, %439 : vector<2x32xf32>
    %441 = arith.addf %436, %440 : vector<2x32xf32>
    %442 = math.tanh %441 : vector<2x32xf32>
    %cst_118 = arith.constant 1.000000e+00 : f32
    %443 = vector.broadcast %cst_118 : f32 to vector<2x32xf32>
    %444 = arith.subf %443, %435 : vector<2x32xf32>
    %445 = arith.mulf %444, %442 : vector<2x32xf32>
    %446 = arith.mulf %435, %390 : vector<2x32xf32>
    %447 = arith.addf %445, %446 : vector<2x32xf32>
    %448 = arith.truncf %447 : vector<2x32xf32> to vector<2x32xbf16>
    %c0_119 = arith.constant 0 : index
    %c0_120 = arith.constant 0 : index
    %449 = vector.load %arg4[%c0_119, %c0_120] : memref<32x128xbf16, #tpu.memory_space<vmem>>, vector<32x128xbf16>
    %cst_121 = arith.constant dense<0.000000e+00> : vector<2x128xf32>
    %450 = tpu.matmul %448, %449, %cst_121 {dimension_numbers = #tpu.dot_dimension_numbers<[1], [0], [0], [1], [0, 0, 1, 1], [], []>} : vector<2x32xbf16>, vector<32x128xbf16>, vector<2x128xf32> -> vector<2x128xf32>
    %451 = vector.extract_strided_slice %450 {offsets = [0, 96], sizes = [2, 32], strides = [1, 1]} : vector<2x128xf32> to vector<2x32xf32>
    %452 = vector.extract_strided_slice %419 {offsets = [0, 96], sizes = [2, 32], strides = [1, 1]} : vector<2x128xf32> to vector<2x32xf32>
    %453 = arith.addf %451, %452 : vector<2x32xf32>
    %454 = math.tanh %453 : vector<2x32xf32>
    %455 = arith.truncf %454 : vector<2x32xf32> to vector<2x32xbf16>
    %c0_122 = arith.constant 0 : index
    %c0_123 = arith.constant 0 : index
    %456 = vector.load %arg7[%c0_122, %c0_123] : memref<32x16xbf16, #tpu.memory_space<vmem>>, vector<32x16xbf16>
    %cst_124 = arith.constant dense<0.000000e+00> : vector<2x16xf32>
    %457 = tpu.matmul %455, %456, %cst_124 {dimension_numbers = #tpu.dot_dimension_numbers<[1], [0], [0], [1], [0, 0, 1, 1], [], []>} : vector<2x32xbf16>, vector<32x16xbf16>, vector<2x16xf32> -> vector<2x16xf32>
    %458 = vector.broadcast %10 : vector<1x16xf32> to vector<2x16xf32>
    %459 = arith.addf %457, %458 : vector<2x16xf32>
    %cst_125 = arith.constant dense<0xFF800000> : vector<2xf32>
    %460 = vector.multi_reduction <maximumf>, %459, %cst_125 [1] : vector<2x16xf32> to vector<2xf32>
    %461 = vector.shape_cast %460 : vector<2xf32> to vector<2x1xf32>
    %462 = vector.broadcast %461 : vector<2x1xf32> to vector<2x16xf32>
    %463 = arith.cmpf oge, %459, %462 : vector<2x16xf32>
    %c16_i32_126 = arith.constant 16 : i32
    %464 = vector.broadcast %c16_i32_126 : i32 to vector<2x16xi32>
    %465 = arith.select %463, %11, %464 : vector<2x16xi1>, vector<2x16xi32>
    %cst_127 = arith.constant dense<2147483647> : vector<2xi32>
    %466 = vector.multi_reduction <minsi>, %465, %cst_127 [1] : vector<2x16xi32> to vector<2xi32>
    %467 = vector.shape_cast %466 : vector<2xi32> to vector<2x1xi32>
    %468 = tpu.concatenate %69, %126, %183, %240, %297, %354, %411, %467 in 1 : vector<2x1xi32>, vector<2x1xi32>, vector<2x1xi32>, vector<2x1xi32>, vector<2x1xi32>, vector<2x1xi32>, vector<2x1xi32>, vector<2x1xi32> -> vector<2x8xi32>
    %c0_128 = arith.constant 0 : index
    %c0_129 = arith.constant 0 : index
    %469 = vector.load %arg9[%c0_128, %c0_129] : memref<2x8xi32, #tpu.memory_space<vmem>>, vector<2x8xi32>
    tpu.vector_store %arg9[%c0_128, %c0_129], %468 {strides = array<i32>} : memref<2x8xi32, #tpu.memory_space<vmem>>, vector<2x8xi32>,
    return
  }
  func.func @transform_0(%arg0: i32) -> (i32, i32) {
    %c0_i32 = arith.constant 0 : i32
    %c0_i32_0 = arith.constant 0 : i32
    return %arg0, %c0_i32 : i32, i32
  }
  func.func @transform_1(%arg0: i32) -> (i32, i32) {
    %c0_i32 = arith.constant 0 : i32
    %c0_i32_0 = arith.constant 0 : i32
    %c0_i32_1 = arith.constant 0 : i32
    return %c0_i32, %c0_i32_0 : i32, i32
  }
  func.func @transform_2(%arg0: i32) -> (i32, i32) {
    %c0_i32 = arith.constant 0 : i32
    %c0_i32_0 = arith.constant 0 : i32
    %c0_i32_1 = arith.constant 0 : i32
    return %c0_i32, %c0_i32_0 : i32, i32
  }
  func.func @transform_3(%arg0: i32) -> (i32, i32) {
    %c0_i32 = arith.constant 0 : i32
    %c0_i32_0 = arith.constant 0 : i32
    %c0_i32_1 = arith.constant 0 : i32
    return %c0_i32, %c0_i32_0 : i32, i32
  }
  func.func @transform_4(%arg0: i32) -> (i32, i32) {
    %c0_i32 = arith.constant 0 : i32
    %c0_i32_0 = arith.constant 0 : i32
    %c0_i32_1 = arith.constant 0 : i32
    return %c0_i32, %c0_i32_0 : i32, i32
  }
  func.func @transform_5(%arg0: i32) -> (i32, i32) {
    %c0_i32 = arith.constant 0 : i32
    %c0_i32_0 = arith.constant 0 : i32
    %c0_i32_1 = arith.constant 0 : i32
    return %c0_i32, %c0_i32_0 : i32, i32
  }
  func.func @transform_6(%arg0: i32) -> (i32, i32) {
    %c0_i32 = arith.constant 0 : i32
    %c0_i32_0 = arith.constant 0 : i32
    %c0_i32_1 = arith.constant 0 : i32
    return %c0_i32, %c0_i32_0 : i32, i32
  }
  func.func @transform_7(%arg0: i32) -> (i32, i32) {
    %c0_i32 = arith.constant 0 : i32
    %c0_i32_0 = arith.constant 0 : i32
    %c0_i32_1 = arith.constant 0 : i32
    return %c0_i32, %c0_i32_0 : i32, i32
  }
  func.func @transform_8(%arg0: i32) -> (i32, i32) {
    %c0_i32 = arith.constant 0 : i32
    %c0_i32_0 = arith.constant 0 : i32
    return %arg0, %c0_i32 : i32, i32
  }
}

</mosaic_0001>

<bundles_post_ra>
// kernel: tpu_custom_call.1
= control target key start
LH: loop header
LB: loop body
LE: loop exit
PB: predicated region body
PF: predicated region fallthrough
CT: control target
= control target key end

     0   :  { %13 = vsyncpa [#allocation3], 0  ;;  %s2675_s0 = inlined_call_operand.vmem [shape: f32[2,32], index: 0, kind: input, shape index: {}]   ;;  %s2676_s1 = inlined_call_operand.vmem [shape: bf16[16,128], index: 1, kind: input, shape index: {}]   ;;  %s2677_s2 = inlined_call_operand.hbm [shape: bf16[32,224], index: 2, kind: input, shape index: {}]   ;;  %s2678_s3 = inlined_call_operand.vmem [shape: bf16[32,128], index: 3, kind: input, shape index: {}]   ;;  %s2679_s4 = inlined_call_operand.hbm [shape: f32[1,128], index: 4, kind: input, shape index: {}]   ;;  %s2680_s5 = inlined_call_operand.hbm [shape: f32[1,32], index: 5, kind: input, shape index: {}]   ;;  %s2681_s6 = inlined_call_operand.vmem [shape: bf16[32,16], index: 6, kind: input, shape index: {}]   ;;  %s2682_s7 = inlined_call_operand.vmem [shape: f32[1,16], index: 7, kind: input, shape index: {}]   ;;  %s2683_s8 = inlined_call_operand.hbm [shape: s32[2,8], index: 8, kind: output, shape index: {}]  }
   0x1   :  { %14 = vsyncpa [#allocation6], 0 }
   0x2   :  { %15 = vsyncpa [#allocation4], 0  ;;  %s2235_s27 = smov [#allocation5]   ;;  %s2236_s29 = smov [#allocation2]  }
   0x3   :  { %s40_s28 = sshll.u32 %s2235_s27, 4  ;;  %s25_s30 = sshll.u32 %s2236_s29, 4  ;;  %s41_s28 = int_to_ptr.vmem [resolvable:$true] %s40_s28  ;;  %s26_s30 = int_to_ptr.vmem [resolvable:$true] %s25_s30 }
   0x4   :  { %s2157_s9 = scalar_lea.vmem %s41_s28, 16  ;;  %s2161_s10 = scalar_lea.vmem %s41_s28, 32 }
   0x5   :  { %p2158_p0 = scmp.ne.s32.totalorder %s41_s28, %s2157_s9  ;;  %p2162_p1 = scmp.lt.s32.totalorder %s41_s28, %s41_s28 }
   0x6   :  { %p2163_p2 = scmp.lt.s32.totalorder %s2161_s10, %s2157_s9 }
   0x8   :  { %p2164_p3 = por %p2163_p2, %p2162_p1 }
   0xa   :  { %p2165_p4 = pnand %p2164_p3, %p2158_p0 }
   0xc   :  { %2168 = shalt.err (!%p2165_p4)
}
   0xd   :  { %43 = dma.hbm_to_vmem [thread:$0]  %s2679_s4, 16, %s41_s28, [#allocation6]  }
   0xe   :  { %s2177_s13 = scalar_lea.vmem %s26_s30, 512  ;;  %p2182_p6 = scmp.lt.s32.totalorder %s26_s30, %s26_s30 }
   0xf   :  { %p2178_p5 = scmp.ne.s32.totalorder %s26_s30, %s2177_s13  ;;  %p2183_p7 = scmp.lt.s32.totalorder %s2177_s13, %s2177_s13 }
  0x11   :  { %p2184_p8 = por %p2183_p7, %p2182_p6 }
  0x13   :  { %p2185_p9 = pnand %p2184_p8, %p2178_p5 }
  0x15   :  { %2188 = shalt.err (!%p2185_p9)
}
  0x16   :  { %s2237_s14 = smov 128   ;;  %s2238_s15 = smov 8  }
  0x17   :  { %31 = dma.hbm_to_vmem [thread:$0]  %s2677_s2, 512, %s26_s30, [#allocation3], %s2237_s14, %s2237_s14, %s2238_s15  }
  0x18   :  { %s2239_s18 = smov [#allocation7]  }
  0x19   :  { %s50_s19 = sshll.u32 %s2239_s18, 4  ;;  %s51_s19 = int_to_ptr.vmem [resolvable:$true] %s50_s19 }
  0x1a   :  { %s2197_s20 = scalar_lea.vmem %s51_s19, 16  ;;  %s2201_s21 = scalar_lea.vmem %s51_s19, 32 }
  0x1b   :  { %p2198_p10 = scmp.ne.s32.totalorder %s51_s19, %s2197_s20  ;;  %p2202_p11 = scmp.lt.s32.totalorder %s51_s19, %s51_s19 }
  0x1c   :  { %p2203_p12 = scmp.lt.s32.totalorder %s2201_s21, %s2197_s20 }
  0x1e   :  { %p2204_p13 = por %p2203_p12, %p2202_p11 }
  0x20   :  { %p2205_p0 = pnand %p2204_p13, %p2198_p10 }
  0x22   :  { %2208 = shalt.err (!%p2205_p0)
}
  0x23   :  { %53 = dma.hbm_to_vmem [thread:$0]  %s2680_s5, 16, %s51_s19, [#allocation6]  }
  0x24   :  { %2229 = dma.done.wait [#allocation3], 512  }
  0x25   :  { %2230 = vsyncadd [#allocation3], 4294966784 }
  0x26   :  { %2231 = dma.done.wait [#allocation6], 32  }
  0x27   :  { %2232 = vsyncadd [#allocation6], 4294967264  ;;  %v2240_v0 = vmov 0.0   ;;  %v2241_v1 = vmov 0   ;;  %v149_v2 = vlaneseq  ;;  %vm2242_vm0 = vmmov 0   ;;  %v2311_v9 = vld [vmem:[%s2676_s1] sm:$0xff]  }
  0x28   :  { %1880 = vmatprep.subr.bf16.mxu1 %v2240_v0  ;;  %130 = vmatprep.mubr.bf16.mxu0 %v2241_v1  ;;  %v2068_v4 = vld [vmem:[#allocation2 + $0x14] ss:$8 sps:$4 sm:$0xff]   ;;  %v2070_v5 = vld [vmem:[#allocation2 + $0x10] ss:$8 sps:$4 sm:$0xff]   ;;  %v2071_v7 = vld [vmem:[#allocation2 + $0x4] ss:$8 sps:$4 sm:$0xff]  }
  0x29   :  { %1882 = vmatprep.mubr.msk.bf16.mxu1 %vm2242_vm0, %v2240_v0  ;;  %v2304_v3 = vand.u32 127, %v149_v2  ;;  %110 = vmatprep.subr.bf16.mxu0 %v2068_v4  ;;  %v2073_v8 = vld [vmem:[#allocation2] ss:$8 sps:$4 sm:$0xff]   ;;  %vm163_vm2 = vcmask 130048   ;;  %s2243_s25 = smov 64   ;;  %vm94_vm3 = vcmask 261120  }
  0x2a   :  { %111 = vmatpush1.bf16.msra.mxu0 %v2070_v5  ;;  %v68_v10 = vld [vmem:[%s2675_s0] sm:$0x3]  ;;  %v1773_v12 = vld [vmem:[#allocation7] ss:$0 sm:$0xff]  ;;  %1881 = vmatpush3.bf16.msra.mxu1 %v2311_v9  ;;  %s2244_s0 = smov 32   ;;  %v2338_v36 = vld [vmem:[%s2678_s3 + $0x8] sm:$0xff]  }
  0x2b   :  { %vm151_vm1 = vcmp.eq.s32.totalorder %v2304_v3, 15  ;;  %112 = vmatprep.subr.bf16.mxu0 %v2071_v7  ;;  %219 = vrot.lane.b32.xlu0 %v1773_v12, %s2243_s25  ;;  %v69_v13 = vpack.c.bf16 %v68_v10, %v68_v10  ;;  %v1768_v24 = vld [vmem:[#allocation5] ss:$0 sm:$0xff]  ;;  %s2245_s30 = smov 96   ;;  %v2363_v47 = vld [vmem:[%s2681_s6 + $0x8] sm:$0xff]   ;;  %vm380_vm4 = vcmask 123904  }
  0x2c   :  { %v1769_v6 = vsel %vm151_vm1, 1.0, %v2240_v0  ;;  %1886 = vmatprep.subr.bf16.mxu1 %v2240_v0  ;;  %v2344_v37 = vld [vmem:[%s2678_s3] sm:$0xff]   ;;  %vm1731_vm13 = vcmask 7168   ;;  %vm1733_vm14 = vcmask 15360  }
  0x2d   :  { %v154_v11 = vpack.c.bf16 %v1769_v6, %v1769_v6  ;;  %v2369_v48 = vld [vmem:[%s2681_s6] sm:$0xff]  }
  0x2e   :  { %113 = vmatpush1.bf16.msra.mxu0 %v2073_v8  ;;  %v2385_v57 = vld [vmem:[%s2682_s7] ss:$0 sm:$0xff] }
  0x2f   :  { %1883 = vmatmul.mubr.msk.bf16.vlgmr.msra.gmra.mxu1 %vm163_vm2, %v154_v11  ;;  %1894 = vmatprep.subr.bf16.mxu0 %v2240_v0 }
  0x30   :  { %1890 = vmatprep.mubr.msk.bf16.mxu1 %vm2242_vm0, %v2240_v0  ;;  %1887 = vmatpush3.bf16.msra.mxu1 %v2338_v36 }
  0x31   :  { %1767 = vmatmul.mubr.msk.bf16.vlgmr.msra.gmra.mxu0 %vm94_vm3, %v69_v13  ;;  %1888 = vmatprep.subr.bf16.mxu1 %v2240_v0 }
  0x32   :  { %1898 = vmatprep.mubr.msk.bf16.mxu0 %vm2242_vm0, %v2240_v0  ;;  %1895 = vmatpush3.bf16.msra.mxu0 %v2363_v47 }
  0x33   :  { %1896 = vmatprep.subr.bf16.mxu0 %v2240_v0 }
  0x34   :  { %1889 = vmatpush3.bf16.msra.mxu1 %v2344_v37 }
  0x35   :  { %1902 = vmatprep.subr.bf16.mxu1 %v2240_v0 }
  0x36   :  { %1897 = vmatpush3.bf16.msra.mxu0 %v2369_v48 }
  0x37   :  { %1908 = vmatprep.subr.bf16.mxu0 %v2240_v0 }
  0x9d   :  { %v2326_v15 = vpop.permute.xlu0 %219 }
  0xef   :  { %v201_v14 = vpop.f32.mrf.mxu1 }
  0xf1   :  { %v132_v16 = vpop.f32.mrf.mxu0  ;;  %v1884_v17 = vpop.f32.mrf.mxu1 }
  0xf2   :  { %v2331_v25 = vadd.f32 %v1768_v24, %v132_v16 }
  0xf3   :  { %v134_v18 = vpop.f32.mrf.mxu0  ;;  %v204_v19 = vpop.f32.mrf.mxu1 }
  0xf4   :  { %v222_v20 = vadd.f32 %v2326_v15, %v134_v18  ;;  %v202_v26 = vadd.f32 %v201_v14, %v2331_v25 }
  0xf5   :  { %v136_v21 = vpop.f32.mrf.mxu0  ;;  %v1885_v22 = vpop.f32.mrf.mxu1 }
  0xf6   :  { %224 = vrot.lane.b32.xlu0 %v222_v20, %s2243_s25  ;;  %v207_v27 = vadd.f32 %v202_v26, %v134_v18 }
  0xf7   :  { %v137_v23 = vpop.f32.mrf.mxu0 }
  0xf8   :  { %v1772_v28 = vmul.f32 -1.442695, %v207_v27 }
  0xfa   :  { %241 = vrot.lane.b32.xlu0 %v68_v10, %s2244_s0  ;;  %2079 = vpow2.f32 %v1772_v28 }
 0x107   :  { %v2080_v29 = vpop.eup %2079 }
 0x108   :  { %v211_v30 = vadd.f32 1.0, %v2080_v29 }
 0x10a   :  { %2081 = vrcp.f32 %v211_v30 }
 0x117   :  { %v2082_v31 = vpop.eup %2081 }
 0x118   :  { %v234_v40 = vsub.f32 1.0, %v2082_v31 }
 0x168   :  { %v225_v32 = vpop.permute.xlu0 %224 }
 0x169   :  { %v227_v33 = vmul.f32 %v2082_v31, %v225_v32 }
 0x16b   :  { %229 = vrot.lane.b32.xlu1 %v227_v33, %s2243_s25 }
 0x16c   :  { %v242_v39 = vpop.permute.xlu0 %241 }
 0x16d   :  { %v244_v42 = vmul.f32 %v2082_v31, %v242_v39 }
 0x1dd   :  { %v230_v34 = vpop.permute.xlu1 %229 }
 0x1de   :  { %v232_v35 = vadd.f32 %v230_v34, %v202_v26 }
 0x1e0   :  { %2083 = vtanh.f32 %v232_v35 }
 0x1ed   :  { %v2084_v38 = vpop.eup %2083 }
 0x1ee   :  { %236 = vrot.lane.b32.xlu1 %v2084_v38, %s2245_s30 }
 0x260   :  { %v237_v41 = vpop.permute.xlu1 %236 }
 0x261   :  { %v239_v43 = vmul.f32 %v237_v41, %v234_v40 }
 0x263   :  { %v2350_v44 = vadd.f32 %v244_v42, %v239_v43 }
 0x265   :  { %v246_v45 = vpack.c.bf16 %v2350_v44, %v2350_v44 }
 0x267   :  { %252 = vrot.lane.b32.xlu1 %v246_v45, %s2245_s30 }
 0x2d9   :  { %v253_v46 = vpop.permute.xlu1 %252 }
 0x2da   :  { %1891 = vmatmul.mubr.msk.bf16.vlgmr.msra.gmra.mxu1 %vm94_vm3, %v253_v46 }
 0x2db   :  { %1903 = vmatpush3.bf16.msra.mxu1 %v2311_v9  ;;  %1904 = vmatprep.mubr.msk.bf16.mxu1 %vm2242_vm0, %v2240_v0 }
 0x2dc   :  { %1916 = vmatprep.subr.bf16.mxu1 %v2240_v0 }
 0x39a   :  { %v303_v49 = vpop.f32.mrf.mxu1 }
 0x39b   :  { %v309_v50 = vadd.f32 %v303_v49, %v202_v26  ;;  %v455_v1 = vadd.f32 %v303_v49, %v2326_v15 }
 0x39c   :  { %v1892_v51 = vpop.f32.mrf.mxu1 }
 0x39d   :  { %2085 = vtanh.f32 %v309_v50 }
 0x39e   :  { %v306_v52 = vpop.f32.mrf.mxu1 }
 0x3a0   :  { %v1893_v53 = vpop.f32.mrf.mxu1 }
 0x3aa   :  { %v2086_v54 = vpop.eup %2085 }
 0x3ab   :  { %v311_v55 = vpack.c.bf16 %v2086_v54, %v2086_v54 }
 0x3ad   :  { %323 = vrot.lane.b32.xlu0 %v311_v55, %s2244_s0 }
 0x41f   :  { %v324_v56 = vpop.permute.xlu0 %323 }
 0x420   :  { %1899 = vmatmul.mubr.msk.bf16.vlgmr.msra.gmra.mxu0 %vm94_vm3, %v324_v56 }
 0x421   :  { %1909 = vmatpush3.bf16.msra.mxu0 %v2338_v36  ;;  %1912 = vmatprep.mubr.msk.bf16.mxu0 %vm2242_vm0, %v2240_v0 }
 0x422   :  { %1910 = vmatprep.subr.bf16.mxu0 %v2240_v0 }
 0x425   :  { %1911 = vmatpush3.bf16.msra.mxu0 %v2344_v37 }
 0x426   :  { %1924 = vmatprep.subr.bf16.mxu0 %v2240_v0 }
 0x4e0   :  { %v374_v58 = vpop.f32.mrf.mxu0 }
 0x4e1   :  { %v375_v59 = vadd.f32 %v2385_v57, %v374_v58 }
 0x4e2   :  { %v1900_v60 = vpop.f32.mrf.mxu0 }
 0x4e3   :  { %v381_v61 = vsel %vm380_vm4, %v375_v59, -inf }
 0x4e4   :  { %382 = vmax.xlane.f32.xlu1 %v381_v61  ;;  %v377_v62 = vpop.f32.mrf.mxu0 }
 0x4e6   :  { %v1901_v63 = vpop.f32.mrf.mxu0 }
 0x4f5   :  { %457 = vrot.lane.b32.xlu1 %v455_v1, %s2243_s25 }
 0x56d   :  { %v383_v2 = vpop.xlane.xlu1 %382 }
 0x56e   :  { %vm384_vm5 = vcmp.ge.f32.partialorder %v375_v59, %v383_v2 }
 0x56f   :  { %v385_v4 = vsel %vm384_vm5, %v2304_v3, 16 }
 0x570   :  { %v386_v5 = vsel %vm380_vm4, %v385_v4, 2147483647 }
 0x571   :  { %v388_v6 = vshra.s32 %v386_v5, 16  ;;  %v387_v8 = vand.u32 65535, %v386_v5  ;;  %v458_v32 = vpop.permute.xlu1 %457 }
 0x573   :  { %v390_v7 = vcvt.s32.f32 %v388_v6  ;;  %v389_v11 = vcvt.s32.f32 %v387_v8 }
 0x575   :  { %391 = vmin.xlane.f32.xlu0 %v390_v7 }
 0x5fe   :  { %v392_v10 = vpop.xlane.xlu0 %391 }
 0x5ff   :  { %vm393_vm6 = vcmp.eq.f32.partialorder %v390_v7, %v392_v10  ;;  %v398_v13 = vcvt.f32.s32 %v392_v10 }
 0x600   :  { %v394_v12 = vsel %vm393_vm6, %v389_v11, inf  ;;  %vm1735_vm6 = vcmask 23552  }
 0x601   :  { %395 = vmin.xlane.f32.xlu0 %v394_v12  ;;  %v399_v16 = vshll.u32 %v398_v13, 16 }
 0x68a   :  { %v396_v14 = vpop.xlane.xlu0 %395 }
 0x68b   :  { %v397_v17 = vcvt.f32.s32 %v396_v14 }
 0x68d   :  { %v2393_v18 = vadd.s32 %v399_v16, %v397_v17 }
 0x68f   :  { %vm401_vm7 = vcmp.eq.s32.totalorder %v2304_v3, %v2393_v18 }
 0x690   :  { %v1781_v19 = vsel %vm401_vm7, 1.0, %v2240_v0 }
 0x691   :  { %v404_v20 = vpack.c.bf16 %v1781_v19, %v1781_v19 }
 0x693   :  { %1905 = vmatmul.mubr.msk.bf16.vlgmr.msra.gmra.mxu1 %vm163_vm2, %v404_v20 }
 0x694   :  { %1917 = vmatpush3.bf16.msra.mxu1 %v2363_v47  ;;  %1920 = vmatprep.mubr.msk.bf16.mxu1 %vm2242_vm0, %v2240_v0 }
 0x695   :  { %1918 = vmatprep.subr.bf16.mxu1 %v2240_v0 }
 0x698   :  { %1919 = vmatpush3.bf16.msra.mxu1 %v2369_v48 }
 0x699   :  { %1930 = vmatprep.subr.bf16.mxu1 %v2240_v0 }
 0x753   :  { %v442_v21 = vpop.f32.mrf.mxu1 }
 0x754   :  { %v443_v22 = vadd.f32 %v442_v21, %v2331_v25 }
 0x755   :  { %v1906_v23 = vpop.f32.mrf.mxu1 }
 0x756   :  { %v448_v24 = vadd.f32 %v443_v22, %v303_v49 }
 0x757   :  { %v445_v26 = vpop.f32.mrf.mxu1 }
 0x758   :  { %v1783_v27 = vmul.f32 -1.442695, %v448_v24 }
 0x759   :  { %v1907_v28 = vpop.f32.mrf.mxu1 }
 0x75a   :  { %2087 = vpow2.f32 %v1783_v27 }
 0x767   :  { %v2088_v29 = vpop.eup %2087 }
 0x768   :  { %v452_v30 = vadd.f32 1.0, %v2088_v29 }
 0x76a   :  { %2089 = vrcp.f32 %v452_v30 }
 0x777   :  { %v2090_v31 = vpop.eup %2089 }
 0x778   :  { %v460_v33 = vmul.f32 %v2090_v31, %v458_v32  ;;  %v467_v39 = vsub.f32 1.0, %v2090_v31  ;;  %v473_v41 = vmul.f32 %v2090_v31, %v2350_v44 }
 0x77a   :  { %462 = vrot.lane.b32.xlu0 %v460_v33, %s2243_s25 }
 0x7ec   :  { %v463_v34 = vpop.permute.xlu0 %462 }
 0x7ed   :  { %v465_v35 = vadd.f32 %v463_v34, %v443_v22 }
 0x7ef   :  { %2091 = vtanh.f32 %v465_v35 }
 0x7fc   :  { %v2092_v38 = vpop.eup %2091 }
 0x7fd   :  { %469 = vrot.lane.b32.xlu1 %v2092_v38, %s2245_s30 }
 0x86f   :  { %v470_v40 = vpop.permute.xlu1 %469 }
 0x870   :  { %v472_v42 = vmul.f32 %v470_v40, %v467_v39 }
 0x872   :  { %v2409_v43 = vadd.f32 %v473_v41, %v472_v42 }
 0x874   :  { %v475_v45 = vpack.c.bf16 %v2409_v43, %v2409_v43 }
 0x876   :  { %477 = vrot.lane.b32.xlu1 %v475_v45, %s2245_s30 }
 0x8e8   :  { %v478_v46 = vpop.permute.xlu1 %477 }
 0x8e9   :  { %1913 = vmatmul.mubr.msk.bf16.vlgmr.msra.gmra.mxu0 %vm94_vm3, %v478_v46 }
 0x8ea   :  { %1925 = vmatpush3.bf16.msra.mxu0 %v2311_v9  ;;  %1926 = vmatprep.mubr.msk.bf16.mxu0 %vm2242_vm0, %v2240_v0 }
 0x8eb   :  { %1938 = vmatprep.subr.bf16.mxu0 %v2240_v0 }
 0x9a9   :  { %v516_v49 = vpop.f32.mrf.mxu0 }
 0x9aa   :  { %v522_v44 = vadd.f32 %v516_v49, %v443_v22  ;;  %v645_v63 = vadd.f32 %v516_v49, %v2326_v15 }
 0x9ab   :  { %v1914_v50 = vpop.f32.mrf.mxu0 }
 0x9ac   :  { %2093 = vtanh.f32 %v522_v44 }
 0x9ad   :  { %v519_v51 = vpop.f32.mrf.mxu0 }
 0x9af   :  { %v1915_v52 = vpop.f32.mrf.mxu0 }
 0x9b9   :  { %v2094_v53 = vpop.eup %2093 }
 0x9ba   :  { %v524_v54 = vpack.c.bf16 %v2094_v53, %v2094_v53 }
 0x9bc   :  { %526 = vrot.lane.b32.xlu0 %v524_v54, %s2244_s0 }
 0xa2e   :  { %v527_v55 = vpop.permute.xlu0 %526 }
 0xa2f   :  { %1921 = vmatmul.mubr.msk.bf16.vlgmr.msra.gmra.mxu1 %vm94_vm3, %v527_v55 }
 0xa30   :  { %1931 = vmatpush3.bf16.msra.mxu1 %v2338_v36  ;;  %1934 = vmatprep.mubr.msk.bf16.mxu1 %vm2242_vm0, %v2240_v0 }
 0xa31   :  { %1932 = vmatprep.subr.bf16.mxu1 %v2240_v0 }
 0xa34   :  { %1933 = vmatpush3.bf16.msra.mxu1 %v2344_v37 }
 0xa35   :  { %1946 = vmatprep.subr.bf16.mxu1 %v2240_v0 }
 0xaef   :  { %v565_v56 = vpop.f32.mrf.mxu1 }
 0xaf0   :  { %v566_v58 = vadd.f32 %v2385_v57, %v565_v56 }
 0xaf1   :  { %v1922_v59 = vpop.f32.mrf.mxu1 }
 0xaf2   :  { %v571_v60 = vsel %vm380_vm4, %v566_v58, -inf }
 0xaf3   :  { %572 = vmax.xlane.f32.xlu1 %v571_v60  ;;  %v568_v61 = vpop.f32.mrf.mxu1 }
 0xaf5   :  { %v1923_v62 = vpop.f32.mrf.mxu1 }
 0xb04   :  { %647 = vrot.lane.b32.xlu1 %v645_v63, %s2243_s25 }
 0xb7c   :  { %v573_v1 = vpop.xlane.xlu1 %572 }
 0xb7d   :  { %vm574_vm8 = vcmp.ge.f32.partialorder %v566_v58, %v573_v1 }
 0xb7e   :  { %v575_v2 = vsel %vm574_vm8, %v2304_v3, 16 }
 0xb7f   :  { %v576_v4 = vsel %vm380_vm4, %v575_v2, 2147483647 }
 0xb80   :  { %v578_v5 = vshra.s32 %v576_v4, 16  ;;  %v577_v7 = vand.u32 65535, %v576_v4  ;;  %v648_v32 = vpop.permute.xlu1 %647 }
 0xb82   :  { %v580_v6 = vcvt.s32.f32 %v578_v5  ;;  %v579_v10 = vcvt.s32.f32 %v577_v7 }
 0xb84   :  { %581 = vmin.xlane.f32.xlu0 %v580_v6 }
 0xc0d   :  { %v582_v8 = vpop.xlane.xlu0 %581 }
 0xc0e   :  { %vm583_vm9 = vcmp.eq.f32.partialorder %v580_v6, %v582_v8  ;;  %v588_v12 = vcvt.f32.s32 %v582_v8 }
 0xc0f   :  { %v584_v11 = vsel %vm583_vm9, %v579_v10, inf }
 0xc10   :  { %585 = vmin.xlane.f32.xlu0 %v584_v11  ;;  %v589_v14 = vshll.u32 %v588_v12, 16 }
 0xc99   :  { %v586_v13 = vpop.xlane.xlu0 %585 }
 0xc9a   :  { %v587_v16 = vcvt.f32.s32 %v586_v13 }
 0xc9c   :  { %v2433_v17 = vadd.s32 %v589_v14, %v587_v16 }
 0xc9e   :  { %vm591_vm10 = vcmp.eq.s32.totalorder %v2304_v3, %v2433_v17 }
 0xc9f   :  { %v1786_v19 = vsel %vm591_vm10, 1.0, %v2240_v0  ;;  %vm1737_vm10 = vcmask 31744  }
 0xca0   :  { %v594_v20 = vpack.c.bf16 %v1786_v19, %v1786_v19 }
 0xca2   :  { %1927 = vmatmul.mubr.msk.bf16.vlgmr.msra.gmra.mxu0 %vm163_vm2, %v594_v20  ;;  %v1732_v20 = vsel %vm1731_vm13, %v2393_v18, %v2433_v17 }
 0xca3   :  { %1939 = vmatpush3.bf16.msra.mxu0 %v2363_v47  ;;  %1942 = vmatprep.mubr.msk.bf16.mxu0 %vm2242_vm0, %v2240_v0 }
 0xca4   :  { %1940 = vmatprep.subr.bf16.mxu0 %v2240_v0 }
 0xca7   :  { %1941 = vmatpush3.bf16.msra.mxu0 %v2369_v48 }
 0xca8   :  { %1952 = vmatprep.subr.bf16.mxu0 %v2240_v0 }
 0xd62   :  { %v632_v21 = vpop.f32.mrf.mxu0 }
 0xd63   :  { %v633_v22 = vadd.f32 %v632_v21, %v2331_v25 }
 0xd64   :  { %v1928_v23 = vpop.f32.mrf.mxu0 }
 0xd65   :  { %v638_v24 = vadd.f32 %v633_v22, %v516_v49 }
 0xd66   :  { %v635_v26 = vpop.f32.mrf.mxu0 }
 0xd67   :  { %v1788_v27 = vmul.f32 -1.442695, %v638_v24 }
 0xd68   :  { %v1929_v28 = vpop.f32.mrf.mxu0 }
 0xd69   :  { %2095 = vpow2.f32 %v1788_v27 }
 0xd76   :  { %v2096_v29 = vpop.eup %2095 }
 0xd77   :  { %v642_v30 = vadd.f32 1.0, %v2096_v29 }
 0xd79   :  { %2097 = vrcp.f32 %v642_v30 }
 0xd86   :  { %v2098_v31 = vpop.eup %2097 }
 0xd87   :  { %v650_v33 = vmul.f32 %v2098_v31, %v648_v32  ;;  %v657_v39 = vsub.f32 1.0, %v2098_v31  ;;  %v663_v41 = vmul.f32 %v2098_v31, %v2409_v43 }
 0xd89   :  { %652 = vrot.lane.b32.xlu0 %v650_v33, %s2243_s25 }
 0xdfb   :  { %v653_v34 = vpop.permute.xlu0 %652 }
 0xdfc   :  { %v655_v35 = vadd.f32 %v653_v34, %v633_v22 }
 0xdfe   :  { %2099 = vtanh.f32 %v655_v35 }
 0xe0b   :  { %v2100_v38 = vpop.eup %2099 }
 0xe0c   :  { %659 = vrot.lane.b32.xlu1 %v2100_v38, %s2245_s30 }
 0xe7e   :  { %v660_v40 = vpop.permute.xlu1 %659 }
 0xe7f   :  { %v662_v42 = vmul.f32 %v660_v40, %v657_v39 }
 0xe81   :  { %v2449_v45 = vadd.f32 %v663_v41, %v662_v42 }
 0xe83   :  { %v665_v46 = vpack.c.bf16 %v2449_v45, %v2449_v45 }
 0xe85   :  { %667 = vrot.lane.b32.xlu1 %v665_v46, %s2245_s30 }
 0xef7   :  { %v668_v49 = vpop.permute.xlu1 %667 }
 0xef8   :  { %1935 = vmatmul.mubr.msk.bf16.vlgmr.msra.gmra.mxu1 %vm94_vm3, %v668_v49 }
 0xef9   :  { %1947 = vmatpush3.bf16.msra.mxu1 %v2311_v9  ;;  %1948 = vmatprep.mubr.msk.bf16.mxu1 %vm2242_vm0, %v2240_v0 }
 0xefa   :  { %1960 = vmatprep.subr.bf16.mxu1 %v2240_v0 }
 0xfb8   :  { %v706_v44 = vpop.f32.mrf.mxu1 }
 0xfb9   :  { %v712_v43 = vadd.f32 %v706_v44, %v633_v22  ;;  %v835_v63 = vadd.f32 %v706_v44, %v2326_v15 }
 0xfba   :  { %v1936_v50 = vpop.f32.mrf.mxu1 }
 0xfbb   :  { %2101 = vtanh.f32 %v712_v43 }
 0xfbc   :  { %v709_v51 = vpop.f32.mrf.mxu1 }
 0xfbe   :  { %v1937_v52 = vpop.f32.mrf.mxu1 }
 0xfc8   :  { %v2102_v53 = vpop.eup %2101 }
 0xfc9   :  { %v714_v54 = vpack.c.bf16 %v2102_v53, %v2102_v53 }
 0xfcb   :  { %716 = vrot.lane.b32.xlu0 %v714_v54, %s2244_s0 }
0x103d   :  { %v717_v55 = vpop.permute.xlu0 %716 }
0x103e   :  { %1943 = vmatmul.mubr.msk.bf16.vlgmr.msra.gmra.mxu0 %vm94_vm3, %v717_v55 }
0x103f   :  { %1953 = vmatpush3.bf16.msra.mxu0 %v2338_v36  ;;  %1956 = vmatprep.mubr.msk.bf16.mxu0 %vm2242_vm0, %v2240_v0 }
0x1040   :  { %1954 = vmatprep.subr.bf16.mxu0 %v2240_v0 }
0x1043   :  { %1955 = vmatpush3.bf16.msra.mxu0 %v2344_v37 }
0x1044   :  { %1968 = vmatprep.subr.bf16.mxu0 %v2240_v0 }
0x10fe   :  { %v755_v56 = vpop.f32.mrf.mxu0 }
0x10ff   :  { %v756_v58 = vadd.f32 %v2385_v57, %v755_v56 }
0x1100   :  { %v1944_v59 = vpop.f32.mrf.mxu0 }
0x1101   :  { %v761_v60 = vsel %vm380_vm4, %v756_v58, -inf }
0x1102   :  { %762 = vmax.xlane.f32.xlu1 %v761_v60  ;;  %v758_v61 = vpop.f32.mrf.mxu0 }
0x1104   :  { %v1945_v62 = vpop.f32.mrf.mxu0 }
0x1113   :  { %837 = vrot.lane.b32.xlu1 %v835_v63, %s2243_s25 }
0x118b   :  { %v763_v1 = vpop.xlane.xlu1 %762 }
0x118c   :  { %vm764_vm11 = vcmp.ge.f32.partialorder %v756_v58, %v763_v1 }
0x118d   :  { %v765_v2 = vsel %vm764_vm11, %v2304_v3, 16 }
0x118e   :  { %v766_v4 = vsel %vm380_vm4, %v765_v2, 2147483647 }
0x118f   :  { %v768_v5 = vshra.s32 %v766_v4, 16  ;;  %v767_v7 = vand.u32 65535, %v766_v4  ;;  %v838_v33 = vpop.permute.xlu1 %837 }
0x1191   :  { %v770_v6 = vcvt.s32.f32 %v768_v5  ;;  %v769_v10 = vcvt.s32.f32 %v767_v7 }
0x1193   :  { %771 = vmin.xlane.f32.xlu0 %v770_v6 }
0x121c   :  { %v772_v8 = vpop.xlane.xlu0 %771 }
0x121d   :  { %vm773_vm12 = vcmp.eq.f32.partialorder %v770_v6, %v772_v8  ;;  %v778_v12 = vcvt.f32.s32 %v772_v8 }
0x121e   :  { %v774_v11 = vsel %vm773_vm12, %v769_v10, inf }
0x121f   :  { %775 = vmin.xlane.f32.xlu0 %v774_v11  ;;  %v779_v14 = vshll.u32 %v778_v12, 16 }
0x12a8   :  { %v776_v13 = vpop.xlane.xlu0 %775 }
0x12a9   :  { %v777_v16 = vcvt.f32.s32 %v776_v13 }
0x12ab   :  { %v780_v19 = vadd.s32 %v779_v14, %v777_v16 }
0x12ad   :  { %vm781_vm15 = vcmp.eq.s32.totalorder %v2304_v3, %v780_v19  ;;  %v2476_v21 = vsel %vm1733_vm14, %v1732_v20, %v780_v19  ;;  %vm1739_vm14 = vcmask 39936  }
0x12ae   :  { %v1791_v22 = vsel %vm781_vm15, 1.0, %v2240_v0 }
0x12af   :  { %v784_v23 = vpack.c.bf16 %v1791_v22, %v1791_v22 }
0x12b1   :  { %1949 = vmatmul.mubr.msk.bf16.vlgmr.msra.gmra.mxu1 %vm163_vm2, %v784_v23 }
0x12b2   :  { %1961 = vmatpush3.bf16.msra.mxu1 %v2363_v47  ;;  %1964 = vmatprep.mubr.msk.bf16.mxu1 %vm2242_vm0, %v2240_v0 }
0x12b3   :  { %1962 = vmatprep.subr.bf16.mxu1 %v2240_v0 }
0x12b6   :  { %1963 = vmatpush3.bf16.msra.mxu1 %v2369_v48 }
0x12b7   :  { %1974 = vmatprep.subr.bf16.mxu1 %v2240_v0 }
0x1371   :  { %v822_v18 = vpop.f32.mrf.mxu1 }
0x1372   :  { %v823_v17 = vadd.f32 %v822_v18, %v2331_v25 }
0x1373   :  { %v1950_v24 = vpop.f32.mrf.mxu1 }
0x1374   :  { %v828_v26 = vadd.f32 %v823_v17, %v706_v44 }
0x1375   :  { %v825_v27 = vpop.f32.mrf.mxu1 }
0x1376   :  { %v1793_v28 = vmul.f32 -1.442695, %v828_v26 }
0x1377   :  { %v1951_v29 = vpop.f32.mrf.mxu1 }
0x1378   :  { %2103 = vpow2.f32 %v1793_v28 }
0x1385   :  { %v2104_v30 = vpop.eup %2103 }
0x1386   :  { %v832_v31 = vadd.f32 1.0, %v2104_v30 }
0x1388   :  { %2105 = vrcp.f32 %v832_v31 }
0x1395   :  { %v2106_v32 = vpop.eup %2105 }
0x1396   :  { %v840_v34 = vmul.f32 %v2106_v32, %v838_v33  ;;  %v847_v40 = vsub.f32 1.0, %v2106_v32  ;;  %v853_v42 = vmul.f32 %v2106_v32, %v2449_v45 }
0x1398   :  { %842 = vrot.lane.b32.xlu0 %v840_v34, %s2243_s25 }
0x140a   :  { %v843_v35 = vpop.permute.xlu0 %842 }
0x140b   :  { %v845_v38 = vadd.f32 %v843_v35, %v823_v17 }
0x140d   :  { %2107 = vtanh.f32 %v845_v38 }
0x141a   :  { %v2108_v39 = vpop.eup %2107 }
0x141b   :  { %849 = vrot.lane.b32.xlu1 %v2108_v39, %s2245_s30 }
0x148d   :  { %v850_v41 = vpop.permute.xlu1 %849 }
0x148e   :  { %v852_v46 = vmul.f32 %v850_v41, %v847_v40 }
0x1490   :  { %v2490_v49 = vadd.f32 %v853_v42, %v852_v46 }
0x1492   :  { %v855_v44 = vpack.c.bf16 %v2490_v49, %v2490_v49 }
0x1494   :  { %857 = vrot.lane.b32.xlu1 %v855_v44, %s2245_s30 }
0x1506   :  { %v858_v43 = vpop.permute.xlu1 %857 }
0x1507   :  { %1957 = vmatmul.mubr.msk.bf16.vlgmr.msra.gmra.mxu0 %vm94_vm3, %v858_v43 }
0x1508   :  { %1969 = vmatpush3.bf16.msra.mxu0 %v2311_v9  ;;  %1970 = vmatprep.mubr.msk.bf16.mxu0 %vm2242_vm0, %v2240_v0 }
0x1509   :  { %1982 = vmatprep.subr.bf16.mxu0 %v2240_v0 }
0x15c7   :  { %v896_v50 = vpop.f32.mrf.mxu0 }
0x15c8   :  { %v902_v45 = vadd.f32 %v896_v50, %v823_v17  ;;  %v1025_v1 = vadd.f32 %v896_v50, %v2326_v15 }
0x15c9   :  { %v1958_v51 = vpop.f32.mrf.mxu0 }
0x15ca   :  { %2109 = vtanh.f32 %v902_v45 }
0x15cb   :  { %v899_v52 = vpop.f32.mrf.mxu0 }
0x15cd   :  { %v1959_v53 = vpop.f32.mrf.mxu0 }
0x15d7   :  { %v2110_v54 = vpop.eup %2109 }
0x15d8   :  { %v904_v55 = vpack.c.bf16 %v2110_v54, %v2110_v54 }
0x15da   :  { %906 = vrot.lane.b32.xlu0 %v904_v55, %s2244_s0 }
0x164c   :  { %v907_v56 = vpop.permute.xlu0 %906 }
0x164d   :  { %1965 = vmatmul.mubr.msk.bf16.vlgmr.msra.gmra.mxu1 %vm94_vm3, %v907_v56 }
0x164e   :  { %1975 = vmatpush3.bf16.msra.mxu1 %v2338_v36  ;;  %1978 = vmatprep.mubr.msk.bf16.mxu1 %vm2242_vm0, %v2240_v0 }
0x164f   :  { %1976 = vmatprep.subr.bf16.mxu1 %v2240_v0 }
0x1652   :  { %1977 = vmatpush3.bf16.msra.mxu1 %v2344_v37 }
0x1653   :  { %1990 = vmatprep.subr.bf16.mxu1 %v2240_v0 }
0x170d   :  { %v945_v58 = vpop.f32.mrf.mxu1 }
0x170e   :  { %v946_v59 = vadd.f32 %v2385_v57, %v945_v58 }
0x170f   :  { %v1966_v60 = vpop.f32.mrf.mxu1 }
0x1710   :  { %v951_v61 = vsel %vm380_vm4, %v946_v59, -inf }
0x1711   :  { %952 = vmax.xlane.f32.xlu1 %v951_v61  ;;  %v948_v62 = vpop.f32.mrf.mxu1 }
0x1713   :  { %v1967_v63 = vpop.f32.mrf.mxu1 }
0x1722   :  { %1027 = vrot.lane.b32.xlu1 %v1025_v1, %s2243_s25 }
0x179a   :  { %v953_v2 = vpop.xlane.xlu1 %952 }
0x179b   :  { %vm954_vm1 = vcmp.ge.f32.partialorder %v946_v59, %v953_v2 }
0x179c   :  { %v955_v4 = vsel %vm954_vm1, %v2304_v3, 16 }
0x179d   :  { %v956_v5 = vsel %vm380_vm4, %v955_v4, 2147483647 }
0x179e   :  { %v958_v6 = vshra.s32 %v956_v5, 16  ;;  %v957_v8 = vand.u32 65535, %v956_v5  ;;  %v1028_v33 = vpop.permute.xlu1 %1027 }
0x17a0   :  { %v960_v7 = vcvt.s32.f32 %v958_v6  ;;  %v959_v11 = vcvt.s32.f32 %v957_v8 }
0x17a2   :  { %961 = vmin.xlane.f32.xlu0 %v960_v7 }
0x182b   :  { %v962_v10 = vpop.xlane.xlu0 %961 }
0x182c   :  { %vm963_vm5 = vcmp.eq.f32.partialorder %v960_v7, %v962_v10  ;;  %v968_v13 = vcvt.f32.s32 %v962_v10 }
0x182d   :  { %v964_v12 = vsel %vm963_vm5, %v959_v11, inf }
0x182e   :  { %965 = vmin.xlane.f32.xlu0 %v964_v12  ;;  %v969_v16 = vshll.u32 %v968_v13, 16 }
0x18b7   :  { %v966_v14 = vpop.xlane.xlu0 %965 }
0x18b8   :  { %v967_v19 = vcvt.f32.s32 %v966_v14 }
0x18ba   :  { %v970_v20 = vadd.s32 %v969_v16, %v967_v19 }
0x18bc   :  { %vm971_vm7 = vcmp.eq.s32.totalorder %v2304_v3, %v970_v20  ;;  %v2516_v22 = vsel %vm1735_vm6, %v2476_v21, %v970_v20  ;;  %vm1741_vm6 = vcmask 48128  }
0x18bd   :  { %v1796_v23 = vsel %vm971_vm7, 1.0, %v2240_v0 }
0x18be   :  { %v974_v18 = vpack.c.bf16 %v1796_v23, %v1796_v23 }
0x18c0   :  { %1971 = vmatmul.mubr.msk.bf16.vlgmr.msra.gmra.mxu0 %vm163_vm2, %v974_v18 }
0x18c1   :  { %1983 = vmatpush3.bf16.msra.mxu0 %v2363_v47  ;;  %1986 = vmatprep.mubr.msk.bf16.mxu0 %vm2242_vm0, %v2240_v0 }
0x18c2   :  { %1984 = vmatprep.subr.bf16.mxu0 %v2240_v0 }
0x18c5   :  { %1985 = vmatpush3.bf16.msra.mxu0 %v2369_v48 }
0x18c6   :  { %1996 = vmatprep.subr.bf16.mxu0 %v2240_v0 }
0x1980   :  { %v1012_v17 = vpop.f32.mrf.mxu0 }
0x1981   :  { %v1013_v21 = vadd.f32 %v1012_v17, %v2331_v25 }
0x1982   :  { %v1972_v24 = vpop.f32.mrf.mxu0 }
0x1983   :  { %v1018_v26 = vadd.f32 %v1013_v21, %v896_v50 }
0x1984   :  { %v1015_v27 = vpop.f32.mrf.mxu0 }
0x1985   :  { %v1798_v28 = vmul.f32 -1.442695, %v1018_v26 }
0x1986   :  { %v1973_v29 = vpop.f32.mrf.mxu0 }
0x1987   :  { %2111 = vpow2.f32 %v1798_v28 }
0x1994   :  { %v2112_v30 = vpop.eup %2111 }
0x1995   :  { %v1022_v31 = vadd.f32 1.0, %v2112_v30 }
0x1997   :  { %2113 = vrcp.f32 %v1022_v31 }
0x19a4   :  { %v2114_v32 = vpop.eup %2113 }
0x19a5   :  { %v1030_v34 = vmul.f32 %v2114_v32, %v1028_v33  ;;  %v1037_v40 = vsub.f32 1.0, %v2114_v32  ;;  %v1043_v42 = vmul.f32 %v2114_v32, %v2490_v49 }
0x19a7   :  { %1032 = vrot.lane.b32.xlu0 %v1030_v34, %s2243_s25 }
0x1a19   :  { %v1033_v35 = vpop.permute.xlu0 %1032 }
0x1a1a   :  { %v1035_v38 = vadd.f32 %v1033_v35, %v1013_v21 }
0x1a1c   :  { %2115 = vtanh.f32 %v1035_v38 }
0x1a29   :  { %v2116_v39 = vpop.eup %2115 }
0x1a2a   :  { %1039 = vrot.lane.b32.xlu1 %v2116_v39, %s2245_s30 }
0x1a9c   :  { %v1040_v41 = vpop.permute.xlu1 %1039 }
0x1a9d   :  { %v1042_v46 = vmul.f32 %v1040_v41, %v1037_v40 }
0x1a9f   :  { %v2530_v44 = vadd.f32 %v1043_v42, %v1042_v46 }
0x1aa1   :  { %v1045_v43 = vpack.c.bf16 %v2530_v44, %v2530_v44 }
0x1aa3   :  { %1047 = vrot.lane.b32.xlu1 %v1045_v43, %s2245_s30 }
0x1b15   :  { %v1048_v50 = vpop.permute.xlu1 %1047 }
0x1b16   :  { %1979 = vmatmul.mubr.msk.bf16.vlgmr.msra.gmra.mxu1 %vm94_vm3, %v1048_v50 }
0x1b17   :  { %1991 = vmatpush3.bf16.msra.mxu1 %v2311_v9  ;;  %1992 = vmatprep.mubr.msk.bf16.mxu1 %vm2242_vm0, %v2240_v0 }
0x1b18   :  { %2004 = vmatprep.subr.bf16.mxu1 %v2240_v0 }
0x1bd6   :  { %v1086_v45 = vpop.f32.mrf.mxu1 }
0x1bd7   :  { %v1092_v49 = vadd.f32 %v1086_v45, %v1013_v21  ;;  %v1215_v1 = vadd.f32 %v1086_v45, %v2326_v15 }
0x1bd8   :  { %v1980_v51 = vpop.f32.mrf.mxu1 }
0x1bd9   :  { %2117 = vtanh.f32 %v1092_v49 }
0x1bda   :  { %v1089_v52 = vpop.f32.mrf.mxu1 }
0x1bdc   :  { %v1981_v53 = vpop.f32.mrf.mxu1 }
0x1be6   :  { %v2118_v54 = vpop.eup %2117 }
0x1be7   :  { %v1094_v55 = vpack.c.bf16 %v2118_v54, %v2118_v54 }
0x1be9   :  { %1096 = vrot.lane.b32.xlu0 %v1094_v55, %s2244_s0 }
0x1c5b   :  { %v1097_v56 = vpop.permute.xlu0 %1096 }
0x1c5c   :  { %1987 = vmatmul.mubr.msk.bf16.vlgmr.msra.gmra.mxu0 %vm94_vm3, %v1097_v56 }
0x1c5d   :  { %1997 = vmatpush3.bf16.msra.mxu0 %v2338_v36  ;;  %2000 = vmatprep.mubr.msk.bf16.mxu0 %vm2242_vm0, %v2240_v0 }
0x1c5e   :  { %1998 = vmatprep.subr.bf16.mxu0 %v2240_v0 }
0x1c61   :  { %1999 = vmatpush3.bf16.msra.mxu0 %v2344_v37 }
0x1c62   :  { %2012 = vmatprep.subr.bf16.mxu0 %v2240_v0 }
0x1d1c   :  { %v1135_v58 = vpop.f32.mrf.mxu0 }
0x1d1d   :  { %v1136_v59 = vadd.f32 %v2385_v57, %v1135_v58 }
0x1d1e   :  { %v1988_v60 = vpop.f32.mrf.mxu0 }
0x1d1f   :  { %v1141_v61 = vsel %vm380_vm4, %v1136_v59, -inf }
0x1d20   :  { %1142 = vmax.xlane.f32.xlu1 %v1141_v61  ;;  %v1138_v62 = vpop.f32.mrf.mxu0 }
0x1d22   :  { %v1989_v63 = vpop.f32.mrf.mxu0 }
0x1d31   :  { %1217 = vrot.lane.b32.xlu1 %v1215_v1, %s2243_s25 }
0x1da9   :  { %v1143_v2 = vpop.xlane.xlu1 %1142 }
0x1daa   :  { %vm1144_vm8 = vcmp.ge.f32.partialorder %v1136_v59, %v1143_v2 }
0x1dab   :  { %v1145_v4 = vsel %vm1144_vm8, %v2304_v3, 16  ;;  %vm1745_vm8 = vcmask 58368  }
0x1dac   :  { %v1146_v5 = vsel %vm380_vm4, %v1145_v4, 2147483647 }
0x1dad   :  { %v1148_v6 = vshra.s32 %v1146_v5, 16  ;;  %v1147_v8 = vand.u32 65535, %v1146_v5  ;;  %v1218_v33 = vpop.permute.xlu1 %1217 }
0x1daf   :  { %v1150_v7 = vcvt.s32.f32 %v1148_v6  ;;  %v1149_v11 = vcvt.s32.f32 %v1147_v8 }
0x1db1   :  { %1151 = vmin.xlane.f32.xlu0 %v1150_v7 }
0x1e3a   :  { %v1152_v10 = vpop.xlane.xlu0 %1151 }
0x1e3b   :  { %vm1153_vm9 = vcmp.eq.f32.partialorder %v1150_v7, %v1152_v10  ;;  %v1158_v13 = vcvt.f32.s32 %v1152_v10 }
0x1e3c   :  { %v1154_v12 = vsel %vm1153_vm9, %v1149_v11, inf }
0x1e3d   :  { %1155 = vmin.xlane.f32.xlu0 %v1154_v12  ;;  %v1159_v16 = vshll.u32 %v1158_v13, 16 }
0x1ec6   :  { %v1156_v14 = vpop.xlane.xlu0 %1155 }
0x1ec7   :  { %v1157_v19 = vcvt.f32.s32 %v1156_v14 }
0x1ec9   :  { %v1160_v20 = vadd.s32 %v1159_v16, %v1157_v19 }
0x1ecb   :  { %vm1161_vm11 = vcmp.eq.s32.totalorder %v2304_v3, %v1160_v20  ;;  %v2556_v23 = vsel %vm1737_vm10, %v2516_v22, %v1160_v20 }
0x1ecc   :  { %v1801_v18 = vsel %vm1161_vm11, 1.0, %v2240_v0 }
0x1ecd   :  { %v1164_v17 = vpack.c.bf16 %v1801_v18, %v1801_v18 }
0x1ecf   :  { %1993 = vmatmul.mubr.msk.bf16.vlgmr.msra.gmra.mxu1 %vm163_vm2, %v1164_v17 }
0x1ed0   :  { %2005 = vmatpush3.bf16.msra.mxu1 %v2363_v47  ;;  %2008 = vmatprep.mubr.msk.bf16.mxu1 %vm2242_vm0, %v2240_v0 }
0x1ed1   :  { %2006 = vmatprep.subr.bf16.mxu1 %v2240_v0 }
0x1ed4   :  { %2007 = vmatpush3.bf16.msra.mxu1 %v2369_v48 }
0x1ed5   :  { %2018 = vmatprep.subr.bf16.mxu1 %v2240_v0 }
0x1f8f   :  { %v1202_v21 = vpop.f32.mrf.mxu1 }
0x1f90   :  { %v1203_v22 = vadd.f32 %v1202_v21, %v2331_v25 }
0x1f91   :  { %v1994_v24 = vpop.f32.mrf.mxu1 }
0x1f92   :  { %v1208_v26 = vadd.f32 %v1203_v22, %v1086_v45 }
0x1f93   :  { %v1205_v27 = vpop.f32.mrf.mxu1 }
0x1f94   :  { %v1803_v28 = vmul.f32 -1.442695, %v1208_v26 }
0x1f95   :  { %v1995_v29 = vpop.f32.mrf.mxu1 }
0x1f96   :  { %2119 = vpow2.f32 %v1803_v28 }
0x1fa3   :  { %v2120_v30 = vpop.eup %2119 }
0x1fa4   :  { %v1212_v31 = vadd.f32 1.0, %v2120_v30 }
0x1fa6   :  { %2121 = vrcp.f32 %v1212_v31 }
0x1fb3   :  { %v2122_v32 = vpop.eup %2121 }
0x1fb4   :  { %v1220_v34 = vmul.f32 %v2122_v32, %v1218_v33  ;;  %v1227_v40 = vsub.f32 1.0, %v2122_v32  ;;  %v1233_v42 = vmul.f32 %v2122_v32, %v2530_v44 }
0x1fb6   :  { %1222 = vrot.lane.b32.xlu0 %v1220_v34, %s2243_s25 }
0x2028   :  { %v1223_v35 = vpop.permute.xlu0 %1222 }
0x2029   :  { %v1225_v38 = vadd.f32 %v1223_v35, %v1203_v22 }
0x202b   :  { %2123 = vtanh.f32 %v1225_v38 }
0x2038   :  { %v2124_v39 = vpop.eup %2123 }
0x2039   :  { %1229 = vrot.lane.b32.xlu1 %v2124_v39, %s2245_s30 }
0x20ab   :  { %v1230_v41 = vpop.permute.xlu1 %1229 }
0x20ac   :  { %v1232_v46 = vmul.f32 %v1230_v41, %v1227_v40  ;;  %v2143_v41 = vld [vmem:[%s2676_s1] sm:$0xff]  }
0x20ae   :  { %v2570_v43 = vadd.f32 %v1233_v42, %v1232_v46 }
0x20b0   :  { %v1235_v50 = vpack.c.bf16 %v2570_v43, %v2570_v43 }
0x20b2   :  { %1237 = vrot.lane.b32.xlu1 %v1235_v50, %s2245_s30 }
0x2124   :  { %v1238_v45 = vpop.permute.xlu1 %1237 }
0x2125   :  { %2001 = vmatmul.mubr.msk.bf16.vlgmr.msra.gmra.mxu0 %vm94_vm3, %v1238_v45 }
0x2126   :  { %2013 = vmatpush3.bf16.msra.mxu0 %v2311_v9  ;;  %2014 = vmatprep.mubr.msk.bf16.mxu0 %vm2242_vm0, %v2240_v0 }
0x2127   :  { %2026 = vmatprep.subr.bf16.mxu0 %v2240_v0 }
0x21e5   :  { %v1276_v49 = vpop.f32.mrf.mxu0 }
0x21e6   :  { %v1282_v44 = vadd.f32 %v1276_v49, %v1203_v22 }
0x21e7   :  { %v2002_v51 = vpop.f32.mrf.mxu0 }
0x21e8   :  { %2125 = vtanh.f32 %v1282_v44 }
0x21e9   :  { %v1279_v52 = vpop.f32.mrf.mxu0 }
0x21ea   :  { %v2144_v52 = vld [vmem:[%s2678_s3 + $0x8] sm:$0xff]  }
0x21eb   :  { %v2003_v53 = vpop.f32.mrf.mxu0 }
0x21ec   :  { %v2145_v53 = vld [vmem:[%s2678_s3] sm:$0xff]  }
0x21f5   :  { %v2126_v54 = vpop.eup %2125 }
0x21f6   :  { %v1284_v55 = vpack.c.bf16 %v2126_v54, %v2126_v54 }
0x21f8   :  { %1286 = vrot.lane.b32.xlu0 %v1284_v55, %s2244_s0  ;;  %v2636_v55 = vld [vmem:[%s2682_s7] ss:$0 sm:$0xff] }
0x226a   :  { %v1287_v56 = vpop.permute.xlu0 %1286 }
0x226b   :  { %2009 = vmatmul.mubr.msk.bf16.vlgmr.msra.gmra.mxu1 %vm94_vm3, %v1287_v56 }
0x226c   :  { %2019 = vmatpush3.bf16.msra.mxu1 %v2338_v36  ;;  %2022 = vmatprep.mubr.msk.bf16.mxu1 %vm2242_vm0, %v2240_v0  ;;  %v1405_v36 = vadd.f32 %v1276_v49, %v2326_v15 }
0x226d   :  { %2020 = vmatprep.subr.bf16.mxu1 %v2240_v0 }
0x2270   :  { %2021 = vmatpush3.bf16.msra.mxu1 %v2344_v37 }
0x2271   :  { %2034 = vmatprep.subr.bf16.mxu1 %v2240_v0 }
0x232b   :  { %v1325_v9 = vpop.f32.mrf.mxu1 }
0x232c   :  { %v1326_v58 = vadd.f32 %v2385_v57, %v1325_v9 }
0x232d   :  { %v2010_v59 = vpop.f32.mrf.mxu1 }
0x232e   :  { %v1331_v60 = vsel %vm380_vm4, %v1326_v58, -inf }
0x232f   :  { %1332 = vmax.xlane.f32.xlu1 %v1331_v60  ;;  %v1328_v61 = vpop.f32.mrf.mxu1 }
0x2331   :  { %v2011_v62 = vpop.f32.mrf.mxu1 }
0x2340   :  { %1407 = vrot.lane.b32.xlu1 %v1405_v36, %s2243_s25 }
0x23b8   :  { %v1333_v63 = vpop.xlane.xlu1 %1332 }
0x23b9   :  { %vm1334_vm12 = vcmp.ge.f32.partialorder %v1326_v58, %v1333_v63 }
0x23ba   :  { %v1335_v1 = vsel %vm1334_vm12, %v2304_v3, 16 }
0x23bb   :  { %v1336_v37 = vsel %vm380_vm4, %v1335_v1, 2147483647 }
0x23bc   :  { %v1338_v2 = vshra.s32 %v1336_v37, 16  ;;  %v1337_v57 = vand.u32 65535, %v1336_v37  ;;  %v1408_v28 = vpop.permute.xlu1 %1407 }
0x23be   :  { %v1340_v4 = vcvt.s32.f32 %v1338_v2  ;;  %v1339_v6 = vcvt.s32.f32 %v1337_v57 }
0x23c0   :  { %1341 = vmin.xlane.f32.xlu0 %v1340_v4 }
0x2449   :  { %v1342_v5 = vpop.xlane.xlu0 %1341 }
0x244a   :  { %vm1343_vm13 = vcmp.eq.f32.partialorder %v1340_v4, %v1342_v5  ;;  %v1348_v8 = vcvt.f32.s32 %v1342_v5 }
0x244b   :  { %v1344_v7 = vsel %vm1343_vm13, %v1339_v6, inf }
0x244c   :  { %1345 = vmin.xlane.f32.xlu0 %v1344_v7  ;;  %v1349_v11 = vshll.u32 %v1348_v8, 16 }
0x24d5   :  { %v1346_v10 = vpop.xlane.xlu0 %1345 }
0x24d6   :  { %v1347_v12 = vcvt.f32.s32 %v1346_v10 }
0x24d8   :  { %v1350_v13 = vadd.s32 %v1349_v11, %v1347_v12 }
0x24da   :  { %vm1351_vm15 = vcmp.eq.s32.totalorder %v2304_v3, %v1350_v13  ;;  %v2596_v14 = vsel %vm1739_vm14, %v2556_v23, %v1350_v13 }
0x24db   :  { %v1806_v16 = vsel %vm1351_vm15, 1.0, %v2240_v0 }
0x24dc   :  { %v1354_v19 = vpack.c.bf16 %v1806_v16, %v1806_v16  ;;  %v2147_v16 = vld [vmem:[%s2681_s6 + $0x8] sm:$0xff]  }
0x24de   :  { %2015 = vmatmul.mubr.msk.bf16.vlgmr.msra.gmra.mxu0 %vm163_vm2, %v1354_v19 }
0x24df   :  { %2027 = vmatpush3.bf16.msra.mxu0 %v2363_v47  ;;  %2030 = vmatprep.mubr.msk.bf16.mxu0 %vm2242_vm0, %v2240_v0 }
0x24e0   :  { %2028 = vmatprep.subr.bf16.mxu0 %v2240_v0 }
0x24e3   :  { %2029 = vmatpush3.bf16.msra.mxu0 %v2369_v48 }
0x24e4   :  { %2040 = vmatprep.subr.bf16.mxu0 %v2240_v0 }
0x259e   :  { %v1392_v20 = vpop.f32.mrf.mxu0 }
0x259f   :  { %v1393_v23 = vadd.f32 %v1392_v20, %v2331_v25 }
0x25a0   :  { %v2016_v18 = vpop.f32.mrf.mxu0 }
0x25a1   :  { %v1398_v17 = vadd.f32 %v1393_v23, %v1276_v49 }
0x25a2   :  { %v1395_v21 = vpop.f32.mrf.mxu0 }
0x25a3   :  { %v1808_v22 = vmul.f32 -1.442695, %v1398_v17 }
0x25a4   :  { %v2017_v24 = vpop.f32.mrf.mxu0 }
0x25a5   :  { %2127 = vpow2.f32 %v1808_v22 }
0x25b2   :  { %v2128_v26 = vpop.eup %2127 }
0x25b3   :  { %v1402_v47 = vadd.f32 1.0, %v2128_v26 }
0x25b5   :  { %2129 = vrcp.f32 %v1402_v47 }
0x25c2   :  { %v2130_v27 = vpop.eup %2129 }
0x25c3   :  { %v1410_v29 = vmul.f32 %v2130_v27, %v1408_v28  ;;  %v1417_v32 = vsub.f32 1.0, %v2130_v27  ;;  %v1423_v34 = vmul.f32 %v2130_v27, %v2570_v43 }
0x25c5   :  { %1412 = vrot.lane.b32.xlu0 %v1410_v29, %s2243_s25 }
0x2637   :  { %v1413_v48 = vpop.permute.xlu0 %1412 }
0x2638   :  { %v1415_v30 = vadd.f32 %v1413_v48, %v1393_v23 }
0x263a   :  { %2131 = vtanh.f32 %v1415_v30 }
0x2647   :  { %v2132_v31 = vpop.eup %2131 }
0x2648   :  { %1419 = vrot.lane.b32.xlu1 %v2132_v31, %s2245_s30 }
0x26ba   :  { %v1420_v33 = vpop.permute.xlu1 %1419 }
0x26bb   :  { %v1422_v35 = vmul.f32 %v1420_v33, %v1417_v32 }
0x26bd   :  { %v2610_v38 = vadd.f32 %v1423_v34, %v1422_v35 }
0x26bf   :  { %v1425_v39 = vpack.c.bf16 %v2610_v38, %v2610_v38 }
0x26c1   :  { %1427 = vrot.lane.b32.xlu1 %v1425_v39, %s2245_s30 }
0x2733   :  { %v1428_v40 = vpop.permute.xlu1 %1427 }
0x2734   :  { %2023 = vmatmul.mubr.msk.bf16.vlgmr.msra.gmra.mxu1 %vm94_vm3, %v1428_v40 }
0x2735   :  { %2035 = vmatpush3.bf16.msra.mxu1 %v2143_v41  ;;  %2036 = vmatprep.mubr.msk.bf16.mxu1 %vm2242_vm0, %v2240_v0 }
0x2736   :  { %2048 = vmatprep.subr.bf16.mxu1 %v2240_v0 }
0x27f4   :  { %v1466_v42 = vpop.f32.mrf.mxu1 }
0x27f5   :  { %v1472_v46 = vadd.f32 %v1466_v42, %v1393_v23  ;;  %v1595_v61 = vadd.f32 %v1466_v42, %v2326_v15 }
0x27f6   :  { %v2024_v43 = vpop.f32.mrf.mxu1 }
0x27f7   :  { %2133 = vtanh.f32 %v1472_v46 }
0x27f8   :  { %v1469_v50 = vpop.f32.mrf.mxu1 }
0x27fa   :  { %v2025_v45 = vpop.f32.mrf.mxu1 }
0x2804   :  { %v2134_v49 = vpop.eup %2133 }
0x2805   :  { %v1474_v44 = vpack.c.bf16 %v2134_v49, %v2134_v49 }
0x2807   :  { %1476 = vrot.lane.b32.xlu0 %v1474_v44, %s2244_s0 }
0x2879   :  { %v1477_v51 = vpop.permute.xlu0 %1476 }
0x287a   :  { %2031 = vmatmul.mubr.msk.bf16.vlgmr.msra.gmra.mxu0 %vm94_vm3, %v1477_v51 }
0x287b   :  { %2041 = vmatpush3.bf16.msra.mxu0 %v2144_v52  ;;  %2044 = vmatprep.mubr.msk.bf16.mxu0 %vm2242_vm0, %v2240_v0 }
0x287c   :  { %2042 = vmatprep.subr.bf16.mxu0 %v2240_v0 }
0x287f   :  { %2043 = vmatpush3.bf16.msra.mxu0 %v2145_v53 }
0x293a   :  { %v1515_v54 = vpop.f32.mrf.mxu0 }
0x293b   :  { %v1516_v56 = vadd.f32 %v2636_v55, %v1515_v54 }
0x293c   :  { %v2032_v9 = vpop.f32.mrf.mxu0 }
0x293d   :  { %v1521_v58 = vsel %vm380_vm4, %v1516_v56, -inf }
0x293e   :  { %1522 = vmax.xlane.f32.xlu1 %v1521_v58  ;;  %v1518_v59 = vpop.f32.mrf.mxu0 }
0x2940   :  { %v2033_v60 = vpop.f32.mrf.mxu0 }
0x294f   :  { %1597 = vrot.lane.b32.xlu1 %v1595_v61, %s2243_s25 }
0x29c7   :  { %v1523_v62 = vpop.xlane.xlu1 %1522 }
0x29c8   :  { %vm1524_vm1 = vcmp.ge.f32.partialorder %v1516_v56, %v1523_v62 }
0x29c9   :  { %v1525_v36 = vsel %vm1524_vm1, %v2304_v3, 16 }
0x29ca   :  { %v1526_v63 = vsel %vm380_vm4, %v1525_v36, 2147483647 }
0x29cb   :  { %v1528_v1 = vshra.s32 %v1526_v63, 16  ;;  %v1527_v2 = vand.u32 65535, %v1526_v63  ;;  %v1598_v27 = vpop.permute.xlu1 %1597 }
0x29cd   :  { %v1530_v37 = vcvt.s32.f32 %v1528_v1  ;;  %v1529_v57 = vcvt.s32.f32 %v1527_v2 }
0x29cf   :  { %1531 = vmin.xlane.f32.xlu0 %v1530_v37 }
0x2a58   :  { %v1532_v4 = vpop.xlane.xlu0 %1531 }
0x2a59   :  { %vm1533_vm5 = vcmp.eq.f32.partialorder %v1530_v37, %v1532_v4  ;;  %v1538_v6 = vcvt.f32.s32 %v1532_v4 }
0x2a5a   :  { %v1534_v5 = vsel %vm1533_vm5, %v1529_v57, inf }
0x2a5b   :  { %1535 = vmin.xlane.f32.xlu0 %v1534_v5  ;;  %v1539_v15 = vshll.u32 %v1538_v6, 16 }
0x2ae4   :  { %v1536_v7 = vpop.xlane.xlu0 %1535 }
0x2ae5   :  { %v1537_v8 = vcvt.f32.s32 %v1536_v7 }
0x2ae7   :  { %v1540_v10 = vadd.s32 %v1539_v15, %v1537_v8 }
0x2ae9   :  { %vm1541_vm7 = vcmp.eq.s32.totalorder %v2304_v3, %v1540_v10  ;;  %v2646_v11 = vsel %vm1741_vm6, %v2596_v14, %v1540_v10  ;;  %v2148_v14 = vld [vmem:[%s2681_s6] sm:$0xff]   ;;  %s2246_s6 = smov [#allocation8]  }
0x2aea   :  { %v1811_v12 = vsel %vm1541_vm7, 1.0, %v2240_v0  ;;  %s1753_s2 = sshll.u32 %s2246_s6, 4  ;;  %s1754_s2 = int_to_ptr.vmem [resolvable:$true] %s1753_s2 }
0x2aeb   :  { %v1544_v13 = vpack.c.bf16 %v1811_v12, %v1811_v12  ;;  %s2209_s5 = scalar_lea.vmem %s1754_s2, 32  ;;  %p2214_p2 = scmp.lt.s32.totalorder %s1754_s2, %s1754_s2 }
0x2aec   :  { %p2210_p1 = scmp.ne.s32.totalorder %s1754_s2, %s2209_s5  ;;  %p2215_p3 = scmp.lt.s32.totalorder %s2209_s5, %s2209_s5 }
0x2aed   :  { %2037 = vmatmul.mubr.msk.bf16.vlgmr.msra.gmra.mxu1 %vm163_vm2, %v1544_v13 }
0x2aee   :  { %2049 = vmatpush3.bf16.msra.mxu1 %v2147_v16  ;;  %2052 = vmatprep.mubr.msk.bf16.mxu1 %vm2242_vm0, %v2240_v0  ;;  %p2216_p4 = por %p2215_p3, %p2214_p2 }
0x2aef   :  { %2050 = vmatprep.subr.bf16.mxu1 %v2240_v0 }
0x2af0   :  { %p2217_p5 = pnand %p2216_p4, %p2210_p1 }
0x2af2   :  { %2051 = vmatpush3.bf16.msra.mxu1 %v2148_v14 }
0x2bad   :  { %v1582_v19 = vpop.f32.mrf.mxu1 }
0x2bae   :  { %v1583_v20 = vadd.f32 %v1582_v19, %v2331_v25 }
0x2baf   :  { %v2038_v23 = vpop.f32.mrf.mxu1 }
0x2bb0   :  { %v1588_v18 = vadd.f32 %v1583_v20, %v1466_v42 }
0x2bb1   :  { %v1585_v17 = vpop.f32.mrf.mxu1 }
0x2bb2   :  { %v1813_v21 = vmul.f32 -1.442695, %v1588_v18 }
0x2bb3   :  { %v2039_v22 = vpop.f32.mrf.mxu1 }
0x2bb4   :  { %2135 = vpow2.f32 %v1813_v21 }
0x2bc1   :  { %v2136_v24 = vpop.eup %2135 }
0x2bc2   :  { %v1592_v26 = vadd.f32 1.0, %v2136_v24 }
0x2bc4   :  { %2137 = vrcp.f32 %v1592_v26 }
0x2bd1   :  { %v2138_v47 = vpop.eup %2137 }
0x2bd2   :  { %v1600_v0 = vmul.f32 %v2138_v47, %v1598_v27  ;;  %v1607_v25 = vsub.f32 1.0, %v2138_v47  ;;  %v1613_v31 = vmul.f32 %v2138_v47, %v2610_v38 }
0x2bd4   :  { %1602 = vrot.lane.b32.xlu0 %v1600_v0, %s2243_s25 }
0x2c46   :  { %v1603_v28 = vpop.permute.xlu0 %1602 }
0x2c47   :  { %v1605_v29 = vadd.f32 %v1603_v28, %v1583_v20 }
0x2c49   :  { %2139 = vtanh.f32 %v1605_v29 }
0x2c56   :  { %v2140_v48 = vpop.eup %2139 }
0x2c57   :  { %1609 = vrot.lane.b32.xlu1 %v2140_v48, %s2245_s30 }
0x2cc9   :  { %v1610_v30 = vpop.permute.xlu1 %1609 }
0x2cca   :  { %v1612_v32 = vmul.f32 %v1610_v30, %v1607_v25 }
0x2ccc   :  { %v1614_v33 = vadd.f32 %v1613_v31, %v1612_v32 }
0x2cce   :  { %v1615_v34 = vpack.c.bf16 %v1614_v33, %v1614_v33 }
0x2cd0   :  { %1617 = vrot.lane.b32.xlu1 %v1615_v34, %s2245_s30 }
0x2d42   :  { %v1618_v35 = vpop.permute.xlu1 %1617 }
0x2d43   :  { %2045 = vmatmul.mubr.msk.bf16.vlgmr.msra.gmra.mxu0 %vm94_vm3, %v1618_v35 }
0x2e03   :  { %v1656_v39 = vpop.f32.mrf.mxu0 }
0x2e04   :  { %v1662_v40 = vadd.f32 %v1656_v39, %v1583_v20 }
0x2e05   :  { %v2046_v41 = vpop.f32.mrf.mxu0 }
0x2e06   :  { %2141 = vtanh.f32 %v1662_v40 }
0x2e07   :  { %v1659_v42 = vpop.f32.mrf.mxu0 }
0x2e09   :  { %v2047_v46 = vpop.f32.mrf.mxu0 }
0x2e13   :  { %v2142_v43 = vpop.eup %2141 }
0x2e14   :  { %v1664_v50 = vpack.c.bf16 %v2142_v43, %v2142_v43 }
0x2e16   :  { %1666 = vrot.lane.b32.xlu0 %v1664_v50, %s2244_s0 }
0x2e88   :  { %v1667_v45 = vpop.permute.xlu0 %1666 }
0x2e89   :  { %2053 = vmatmul.mubr.msk.bf16.vlgmr.msra.gmra.mxu1 %vm94_vm3, %v1667_v45  ;;  %vm1743_vm3 = vcmask 56320  }
0x2f49   :  { %v1705_v38 = vpop.f32.mrf.mxu1 }
0x2f4a   :  { %v1706_v49 = vadd.f32 %v2636_v55, %v1705_v38 }
0x2f4b   :  { %v2054_v44 = vpop.f32.mrf.mxu1 }
0x2f4c   :  { %v1711_v51 = vsel %vm380_vm4, %v1706_v49, -inf }
0x2f4d   :  { %1712 = vmax.xlane.f32.xlu1 %v1711_v51  ;;  %v1708_v52 = vpop.f32.mrf.mxu1 }
0x2f4f   :  { %v2055_v53 = vpop.f32.mrf.mxu1 }
0x2fd6   :  { %v1713_v54 = vpop.xlane.xlu1 %1712 }
0x2fd7   :  { %vm1714_vm0 = vcmp.ge.f32.partialorder %v1706_v49, %v1713_v54 }
0x2fd8   :  { %v1715_v56 = vsel %vm1714_vm0, %v2304_v3, 16 }
0x2fd9   :  { %v1716_v9 = vsel %vm380_vm4, %v1715_v56, 2147483647 }
0x2fda   :  { %v1718_v58 = vshra.s32 %v1716_v9, 16  ;;  %v1717_v60 = vand.u32 65535, %v1716_v9 }
0x2fdc   :  { %v1720_v59 = vcvt.s32.f32 %v1718_v58  ;;  %v1719_v62 = vcvt.s32.f32 %v1717_v60 }
0x2fde   :  { %1721 = vmin.xlane.f32.xlu0 %v1720_v59 }
0x3067   :  { %v1722_v61 = vpop.xlane.xlu0 %1721 }
0x3068   :  { %vm1723_vm2 = vcmp.eq.f32.partialorder %v1720_v59, %v1722_v61  ;;  %v1728_v36 = vcvt.f32.s32 %v1722_v61 }
0x3069   :  { %v1724_v55 = vsel %vm1723_vm2, %v1719_v62, inf }
0x306a   :  { %1725 = vmin.xlane.f32.xlu0 %v1724_v55  ;;  %v1729_v1 = vshll.u32 %v1728_v36, 16 }
0x30f3   :  { %v1726_v63 = vpop.xlane.xlu0 %1725 }
0x30f4   :  { %v1727_v37 = vcvt.f32.s32 %v1726_v63 }
0x30f6   :  { %v1730_v2 = vadd.s32 %v1729_v1, %v1727_v37 }
0x30f8   :  { %v1744_v3 = vsel %vm1743_vm3, %v2646_v11, %v1730_v2 }
0x30f9   :  { %1746 = vst.msk [vmem:[#allocation8] sm:$0x3] %vm1745_vm8, %v1744_v3 }
0x30fa   :  { %2220 = shalt.err (!%p2217_p5)
}
0x30fb   :  { %1756 = dma.vmem_to_hbm [thread:$0]  %s1754_s2, 32, %s2683_s8, [#allocation4]  }
0x30fc   :  { %2233 = dma.done.wait [#allocation4], 32  }
0x30fd   :  { %2234 = vsyncadd [#allocation4], 4294967264 }
0x30fe   :  { %1760 = vsyncpa [#allocation3], 1 }
0x30ff   :  { %1761 = vsyncpa [#allocation6], 1 }
0x3100   :  { %1762 = vsyncpa [#allocation4], 1 }

</bundles_post_ra>
